<compile_context>
chip_gen: v5e
topology: v5e:2x2
jax: 0.10.0
libtpu: 0.0.40
codegen_flags: <defaults>
</compile_context>

<pallas_src>
import functools

import jax
import jax.numpy as jnp
from jax import lax
from jax.experimental import pallas as pl
from jax.experimental.pallas import tpu as pltpu

_LN_EPS = 1e-5


# ----------------------------------------------------------------------------
# Fused kernel: one grid step == one batch block; full time loop inside.
# ----------------------------------------------------------------------------
def _fused_rnn_kernel(frames_ref, mask_ref,
                      w_start_ref, g_start_ref, b_start_ref, w_last_ref,
                      w_t_ref, g_t_ref, b_t_ref,
                      w_tn_ref, g_tn_ref, b_tn_ref,
                      w_s_ref, g_s_ref, b_s_ref,
                      out_ref,
                      T_state, t_bank,
                      *, H, L, tau, input_length, n_steps, residual, recall):
    B = frames_ref.shape[1]
    F = frames_ref.shape[2]

    # Fresh recurrent state for this batch block (matches the reference's
    # zero-initialized T_t and tau zero entries in T_pre).
    T_state[...] = jnp.zeros_like(T_state)
    t_bank[...] = jnp.zeros_like(t_bank)

    inv_tau = 1.0 / float(tau)

    def lin_ln(x, w, g, b):
        y = jnp.dot(x, w, preferred_element_type=jnp.float32)
        mu = jnp.mean(y, axis=-1, keepdims=True)
        var = jnp.mean(jnp.square(y - mu), axis=-1, keepdims=True)
        return (y - mu) * lax.rsqrt(var + _LN_EPS) * g + b

    def step(t, net):
        frames_feature = lin_ln(net, w_start_ref[...], g_start_ref[...],
                                b_start_ref[...])
        slot = t % tau
        S_t = frames_feature
        for l in range(L):                       # static unroll over layers
            T_t = T_state[l]                     # [B, H]

            # s_att == 0 forever (reference never appends to S_pre), so the
            # attention softmax is exactly uniform: T_trend = mean over bank.
            bank = t_bank[pl.ds(l * tau, tau)]   # [tau, B, H]
            T_trend = jnp.sum(bank, axis=0) * inv_tau             # [B, H]

            t_next = lin_ln(T_t, w_tn_ref[l], g_tn_ref[l], b_tn_ref[l])
            fuse_gate = jax.nn.sigmoid(t_next)
            T_fusion = fuse_gate * T_t + (1.0 - fuse_gate) * T_trend

            T_concat = lin_ln(T_fusion, w_t_ref[l], g_t_ref[l], b_t_ref[l])  # [B, 3H]
            S_concat = lin_ln(S_t, w_s_ref[l], g_s_ref[l], b_s_ref[l])       # [B, 3H]

            t_g, t_tt, t_ss = (T_concat[:, 0:H], T_concat[:, H:2 * H],
                               T_concat[:, 2 * H:3 * H])
            s_g, s_tt, s_ss = (S_concat[:, 0:H], S_concat[:, H:2 * H],
                               S_concat[:, 2 * H:3 * H])

            T_gate = jax.nn.sigmoid(t_g)
            S_gate = jax.nn.sigmoid(s_g)
            T_new = T_gate * t_tt + (1.0 - T_gate) * s_tt
            S_new = S_gate * s_ss + (1.0 - S_gate) * t_ss
            if residual:                         # cell_mode == 'residual'
                S_new = S_new + S_t

            T_state[l] = T_new
            # Ring-buffer append == T_pre[l].append(T_t[l]); slot order inside
            # the bank is irrelevant because only its mean is consumed.
            t_bank[l * tau + slot] = T_new
            S_t = S_new

        out = S_t
        if recall:                               # model_mode == 'recall'
            out = out + frames_feature
        x_gen = jnp.dot(out, w_last_ref[...], preferred_element_type=jnp.float32)
        out_ref[t] = x_gen                       # VMEM store; one HBM DMA at end
        return x_gen

    def warm_body(t, x_gen):
        del x_gen
        return step(t, frames_ref[t])

    def pred_body(t, x_gen):
        m = mask_ref[t - input_length]
        net = m * frames_ref[t] + (1.0 - m) * x_gen
        return step(t, net)

    x_gen = jnp.zeros((B, F), jnp.float32)
    warm = min(input_length, n_steps)            # static phase boundary
    if warm > 0:
        x_gen = lax.fori_loop(0, warm, warm_body, x_gen)
    if warm < n_steps:
        x_gen = lax.fori_loop(warm, n_steps, pred_body, x_gen)


# ----------------------------------------------------------------------------
# Wrapper: one pallas_call for the whole sequence.
# ----------------------------------------------------------------------------
def _const_spec(x):
    nd = x.ndim
    return pl.BlockSpec(x.shape, lambda b, _nd=nd: (0,) * _nd)


def rnn_forward(frames, mask_true, params, configs, num_layers, num_hidden):
    B, T, F = frames.shape
    H = num_hidden[0]
    assert all(h == H for h in num_hidden), "fused kernel assumes equal hidden sizes"
    tau = configs['tau']
    Tin = configs['input_length']
    n_steps = T - 1
    residual = (configs['cell_mode'] == 'residual')
    recall = (configs['model_mode'] == 'recall')

    # Sublane fill: pad batch to a multiple of 8 rows; padded rows are
    # independent (per-row ops only) and sliced off afterwards.
    B_pad = max(8, -(-B // 8) * 8)

    frames_tm = jnp.transpose(frames, (1, 0, 2)).astype(jnp.float32)    # [T, B, F]
    mask_tm = jnp.transpose(mask_true, (1, 0, 2)).astype(jnp.float32)   # [Tm, B, F]
    if mask_tm.shape[0] == 0:    # no prediction phase; keep a valid (unused) block
        mask_tm = jnp.zeros((1, B, F), jnp.float32)
    if B_pad != B:
        pad = ((0, 0), (0, B_pad - B), (0, 0))
        frames_tm = jnp.pad(frames_tm, pad)
        mask_tm = jnp.pad(mask_tm, pad)
    Tm = mask_tm.shape[0]

    # One batch block per grid step; "parallel" axis lets v7x shard blocks
    # across its two TensorCores when the batch is large enough to split.
    B_BLK = B_pad
    n_blocks = B_pad // B_BLK

    weight_args = (
        params['w_start'], params['g_start'], params['b_start'], params['w_last'],
        params['w_t'], params['g_t'], params['b_t'],
        params['w_tn'], params['g_tn'], params['b_tn'],
        params['w_s'], params['g_s'], params['b_s'],
    )

    kernel = functools.partial(
        _fused_rnn_kernel, H=H, L=num_layers, tau=tau,
        input_length=Tin, n_steps=n_steps, residual=residual, recall=recall)

    grid_spec = pltpu.PrefetchScalarGridSpec(
        num_scalar_prefetch=0,
        grid=(n_blocks,),
        in_specs=[
            pl.BlockSpec((T, B_BLK, F), lambda b: (0, b, 0)),      # frames (whole seq)
            pl.BlockSpec((Tm, B_BLK, F), lambda b: (0, b, 0)),     # mask   (whole seq)
        ] + [_const_spec(w) for w in weight_args],                 # weights: loaded once
        out_specs=pl.BlockSpec((n_steps, B_BLK, F), lambda b: (0, b, 0)),
        scratch_shapes=[
            pltpu.VMEM((num_layers, B_BLK, H), jnp.float32),           # T_t per layer
            pltpu.VMEM((num_layers * tau, B_BLK, H), jnp.float32),     # temporal ring buffer
        ],
    )

    out_tm = pl.pallas_call(
        kernel,
        grid_spec=grid_spec,
        out_shape=jax.ShapeDtypeStruct((n_steps, B_pad, F), jnp.float32),
        compiler_params=pltpu.CompilerParams(dimension_semantics=("parallel",)),
    )(frames_tm, mask_tm, *weight_args)

    return jnp.transpose(out_tm[:, :B, :], (1, 0, 2))              # [B, T-1, F]


# ----------------------------------------------------------------------------
# Parameter construction (deterministic; Linear weights pre-transposed [in,out])
# ----------------------------------------------------------------------------
def init_params(key, in_features, num_layers, num_hidden):
    H = num_hidden[0]
    assert all(h == H for h in num_hidden)
    F = in_features
    L = num_layers
    scale = 0.02
    ks = jax.random.split(key, 2 + 3 * L)

    def lin_w(k, din, dout):
        return scale * jax.random.normal(k, (din, dout), jnp.float32)

    def stack(fn):
        return jnp.stack([fn(i) for i in range(L)], axis=0)

    return {
        'w_start': lin_w(ks[0], F, H),
        'g_start': jnp.ones((1, H), jnp.float32),
        'b_start': jnp.zeros((1, H), jnp.float32),
        'w_last': lin_w(ks[1], H, F),
        # stacked per-layer LMAU cell weights: leading axis = layer
        'w_t':  stack(lambda i: lin_w(ks[2 + 3 * i + 0], H, 3 * H)),
        'g_t':  jnp.ones((L, 1, 3 * H), jnp.float32),
        'b_t':  jnp.zeros((L, 1, 3 * H), jnp.float32),
        'w_tn': stack(lambda i: lin_w(ks[2 + 3 * i + 1], H, H)),
        'g_tn': jnp.ones((L, 1, H), jnp.float32),
        'b_tn': jnp.zeros((L, 1, H), jnp.float32),
        'w_s':  stack(lambda i: lin_w(ks[2 + 3 * i + 2], H, 3 * H)),
        'g_s':  jnp.ones((L, 1, 3 * H), jnp.float32),
        'b_s':  jnp.zeros((L, 1, 3 * H), jnp.float32),
    }


# ----------------------------------------------------------------------------
if __name__ == "__main__":
    configs = {
        'in_features': 16,
        'tau': 4,
        'cell_mode': 'normal',
        'model_mode': 'recall',
        'total_length': 8,
        'input_length': 4,
    }
    assert configs['model_mode'] in ('recall', 'normal')

    num_layers = 2
    num_hidden = [32, 32]
    batch = 2

    key = jax.random.PRNGKey(0)
    k_param, k_frames, k_mask = jax.random.split(key, 3)

    params = init_params(k_param, configs['in_features'], num_layers, num_hidden)

    frames = jax.random.normal(
        k_frames, (batch, configs['total_length'], configs['in_features']), jnp.float32)
    n_mask = configs['total_length'] - configs['input_length'] - 1
    mask_true = (jax.random.uniform(
        k_mask, (batch, n_mask, configs['in_features'])) > 0.5).astype(jnp.float32)

    fwd = jax.jit(functools.partial(
        rnn_forward, configs=configs, num_layers=num_layers, num_hidden=tuple(num_hidden)))
    out = fwd(frames, mask_true, params)
    out = jax.block_until_ready(out)

    expected_shape = (batch, configs['total_length'] - 1, configs['in_features'])
    assert out.shape == expected_shape, (out.shape, expected_shape)
    assert bool(jnp.all(jnp.isfinite(out)))
    print("KERNEL_OK")
</pallas_src>

<mosaic_0001>
module attributes {stable_mosaic.version = 11 : i64} {
  func.func @_fused_rnn_kernel(%arg0: i32, %arg1: memref<8x8x16xf32, #tpu.memory_space<vmem>>, %arg2: memref<3x8x16xf32, #tpu.memory_space<vmem>>, %arg3: memref<16x32xf32, #tpu.memory_space<vmem>>, %arg4: memref<1x32xf32, #tpu.memory_space<vmem>>, %arg5: memref<1x32xf32, #tpu.memory_space<vmem>>, %arg6: memref<32x16xf32, #tpu.memory_space<vmem>>, %arg7: memref<2x32x96xf32, #tpu.memory_space<vmem>>, %arg8: memref<2x1x96xf32, #tpu.memory_space<vmem>>, %arg9: memref<2x1x96xf32, #tpu.memory_space<vmem>>, %arg10: memref<2x32x32xf32, #tpu.memory_space<vmem>>, %arg11: memref<2x1x32xf32, #tpu.memory_space<vmem>>, %arg12: memref<2x1x32xf32, #tpu.memory_space<vmem>>, %arg13: memref<2x32x96xf32, #tpu.memory_space<vmem>>, %arg14: memref<2x1x96xf32, #tpu.memory_space<vmem>>, %arg15: memref<2x1x96xf32, #tpu.memory_space<vmem>>, %arg16: memref<7x8x16xf32, #tpu.memory_space<vmem>>, %arg17: memref<2x8x32xf32, #tpu.memory_space<vmem>>, %arg18: memref<8x8x32xf32, #tpu.memory_space<vmem>>) attributes {dimension_semantics = [#tpu.dimension_semantics<parallel>], iteration_bounds = array<i64: 1>, scalar_prefetch = 0 : i64, scratch_operands = 2 : i64, tpu.core_type = #tpu.core_type<tc>, window_params = [{transform_indices = @transform_0, window_bounds = array<i64: 8, 8, 16>}, {transform_indices = @transform_1, window_bounds = array<i64: 3, 8, 16>}, {pipeline_mode = #tpu.pipeline_mode<synchronous>, transform_indices = @transform_2, window_bounds = array<i64: 16, 32>}, {pipeline_mode = #tpu.pipeline_mode<synchronous>, transform_indices = @transform_3, window_bounds = array<i64: 1, 32>}, {pipeline_mode = #tpu.pipeline_mode<synchronous>, transform_indices = @transform_4, window_bounds = array<i64: 1, 32>}, {pipeline_mode = #tpu.pipeline_mode<synchronous>, transform_indices = @transform_5, window_bounds = array<i64: 32, 16>}, {pipeline_mode = #tpu.pipeline_mode<synchronous>, transform_indices = @transform_6, window_bounds = array<i64: 2, 32, 96>}, {pipeline_mode = #tpu.pipeline_mode<synchronous>, transform_indices = @transform_7, window_bounds = array<i64: 2, 1, 96>}, {pipeline_mode = #tpu.pipeline_mode<synchronous>, transform_indices = @transform_8, window_bounds = array<i64: 2, 1, 96>}, {pipeline_mode = #tpu.pipeline_mode<synchronous>, transform_indices = @transform_9, window_bounds = array<i64: 2, 32, 32>}, {pipeline_mode = #tpu.pipeline_mode<synchronous>, transform_indices = @transform_10, window_bounds = array<i64: 2, 1, 32>}, {pipeline_mode = #tpu.pipeline_mode<synchronous>, transform_indices = @transform_11, window_bounds = array<i64: 2, 1, 32>}, {pipeline_mode = #tpu.pipeline_mode<synchronous>, transform_indices = @transform_12, window_bounds = array<i64: 2, 32, 96>}, {pipeline_mode = #tpu.pipeline_mode<synchronous>, transform_indices = @transform_13, window_bounds = array<i64: 2, 1, 96>}, {pipeline_mode = #tpu.pipeline_mode<synchronous>, transform_indices = @transform_14, window_bounds = array<i64: 2, 1, 96>}, {transform_indices = @transform_15, window_bounds = array<i64: 7, 8, 16>}]} {
    %cst = arith.constant 0.000000e+00 : f32
    %0 = vector.broadcast %cst : f32 to vector<2x8x32xf32>
    %c0 = arith.constant 0 : index
    %c0_0 = arith.constant 0 : index
    %c0_1 = arith.constant 0 : index
    %1 = vector.load %arg17[%c0, %c0_0, %c0_1] : memref<2x8x32xf32, #tpu.memory_space<vmem>>, vector<2x8x32xf32>
    tpu.vector_store %arg17[%c0, %c0_0, %c0_1], %0 {strides = array<i32>} : memref<2x8x32xf32, #tpu.memory_space<vmem>>, vector<2x8x32xf32>,
    %cst_2 = arith.constant 0.000000e+00 : f32
    %2 = vector.broadcast %cst_2 : f32 to vector<8x8x32xf32>
    %c0_3 = arith.constant 0 : index
    %c0_4 = arith.constant 0 : index
    %c0_5 = arith.constant 0 : index
    %3 = vector.load %arg18[%c0_3, %c0_4, %c0_5] : memref<8x8x32xf32, #tpu.memory_space<vmem>>, vector<8x8x32xf32>
    tpu.vector_store %arg18[%c0_3, %c0_4, %c0_5], %2 {strides = array<i32>} : memref<8x8x32xf32, #tpu.memory_space<vmem>>, vector<8x8x32xf32>,
    %cst_6 = arith.constant 0.000000e+00 : f32
    %4 = vector.broadcast %cst_6 : f32 to vector<8x16xf32>
    %c0_i32 = arith.constant 0 : i32
    %c4_i32 = arith.constant 4 : i32
    %5 = arith.addi %c0_i32, %c4_i32 : i32
    %c1_i32 = arith.constant 1 : i32
    %6 = scf.for %arg19 = %c0_i32 to %5 step %c1_i32 iter_args(%arg20 = %4) -> (vector<8x16xf32>)  : i32 {
      %9 = arith.index_cast %arg19 : i32 to index
      %c0_11 = arith.constant 0 : index
      %c0_12 = arith.constant 0 : index
      %10 = vector.load %arg1[%9, %c0_11, %c0_12] : memref<8x8x16xf32, #tpu.memory_space<vmem>>, vector<1x8x16xf32>
      %11 = vector.shape_cast %10 : vector<1x8x16xf32> to vector<8x16xf32>
      %c0_13 = arith.constant 0 : index
      %c0_14 = arith.constant 0 : index
      %12 = vector.load %arg3[%c0_13, %c0_14] : memref<16x32xf32, #tpu.memory_space<vmem>>, vector<16x32xf32>
      %c0_15 = arith.constant 0 : index
      %c0_16 = arith.constant 0 : index
      %13 = vector.load %arg4[%c0_15, %c0_16] : memref<1x32xf32, #tpu.memory_space<vmem>>, vector<1x32xf32>
      %c0_17 = arith.constant 0 : index
      %c0_18 = arith.constant 0 : index
      %14 = vector.load %arg5[%c0_17, %c0_18] : memref<1x32xf32, #tpu.memory_space<vmem>>, vector<1x32xf32>
      %cst_19 = arith.constant dense<0.000000e+00> : vector<8x32xf32>
      %15 = tpu.matmul %11, %12, %cst_19 {dimension_numbers = #tpu.dot_dimension_numbers<[1], [0], [0], [1], [0, 0, 1, 1], [], []>} : vector<8x16xf32>, vector<16x32xf32>, vector<8x32xf32> -> vector<8x32xf32>
      %cst_20 = arith.constant dense<0.000000e+00> : vector<8xf32>
      %16 = vector.multi_reduction <add>, %15, %cst_20 [1] : vector<8x32xf32> to vector<8xf32>
      %17 = vector.shape_cast %16 : vector<8xf32> to vector<8x1xf32>
      %cst_21 = arith.constant 3.200000e+01 : f32
      %18 = vector.broadcast %cst_21 : f32 to vector<8x1xf32>
      %19 = arith.divf %17, %18 : vector<8x1xf32>
      %20 = vector.broadcast %19 : vector<8x1xf32> to vector<8x32xf32>
      %21 = arith.subf %15, %20 : vector<8x32xf32>
      %22 = arith.mulf %21, %21 : vector<8x32xf32>
      %cst_22 = arith.constant dense<0.000000e+00> : vector<8xf32>
      %23 = vector.multi_reduction <add>, %22, %cst_22 [1] : vector<8x32xf32> to vector<8xf32>
      %24 = vector.shape_cast %23 : vector<8xf32> to vector<8x1xf32>
      %cst_23 = arith.constant 3.200000e+01 : f32
      %25 = vector.broadcast %cst_23 : f32 to vector<8x1xf32>
      %26 = arith.divf %24, %25 : vector<8x1xf32>
      %27 = vector.broadcast %19 : vector<8x1xf32> to vector<8x32xf32>
      %28 = arith.subf %15, %27 : vector<8x32xf32>
      %cst_24 = arith.constant 9.99999974E-6 : f32
      %29 = vector.broadcast %cst_24 : f32 to vector<8x1xf32>
      %30 = arith.addf %26, %29 : vector<8x1xf32>
      %31 = math.rsqrt %30 : vector<8x1xf32>
      %32 = vector.broadcast %31 : vector<8x1xf32> to vector<8x32xf32>
      %33 = arith.mulf %28, %32 : vector<8x32xf32>
      %34 = vector.broadcast %13 : vector<1x32xf32> to vector<8x32xf32>
      %35 = arith.mulf %33, %34 : vector<8x32xf32>
      %36 = vector.broadcast %14 : vector<1x32xf32> to vector<8x32xf32>
      %37 = arith.addf %35, %36 : vector<8x32xf32>
      %c4_i32_25 = arith.constant 4 : i32
      %c0_i32_26 = arith.constant 0 : i32
      %38 = arith.cmpi eq, %c4_i32_25, %c0_i32_26 : i32
      %c1_i32_27 = arith.constant 1 : i32
      %39 = arith.select %38, %c1_i32_27, %c4_i32_25 : i32
      %40 = arith.remsi %arg19, %39 : i32
      %c0_i32_28 = arith.constant 0 : i32
      %41 = arith.cmpi ne, %40, %c0_i32_28 : i32
      %c0_i32_29 = arith.constant 0 : i32
      %42 = arith.cmpi slt, %40, %c0_i32_29 : i32
      %c0_i32_30 = arith.constant 0 : i32
      %43 = arith.cmpi slt, %39, %c0_i32_30 : i32
      %44 = arith.xori %42, %43 : i1
      %45 = arith.andi %44, %41 : i1
      %46 = arith.addi %40, %39 : i32
      %47 = arith.select %45, %46, %40 : i32
      %c0_31 = arith.constant 0 : index
      %c0_32 = arith.constant 0 : index
      %c0_33 = arith.constant 0 : index
      %48 = vector.load %arg17[%c0_31, %c0_32, %c0_33] : memref<2x8x32xf32, #tpu.memory_space<vmem>>, vector<1x8x32xf32>
      %49 = vector.shape_cast %48 : vector<1x8x32xf32> to vector<8x32xf32>
      %c0_34 = arith.constant 0 : index
      %c0_35 = arith.constant 0 : index
      %c0_36 = arith.constant 0 : index
      %50 = vector.load %arg18[%c0_34, %c0_35, %c0_36] : memref<8x8x32xf32, #tpu.memory_space<vmem>>, vector<4x8x32xf32>
      %cst_37 = arith.constant dense<0.000000e+00> : vector<8x32xf32>
      %51 = vector.multi_reduction <add>, %50, %cst_37 [0] : vector<4x8x32xf32> to vector<8x32xf32>
      %cst_38 = arith.constant 2.500000e-01 : f32
      %52 = vector.broadcast %cst_38 : f32 to vector<8x32xf32>
      %53 = arith.mulf %51, %52 : vector<8x32xf32>
      %c0_39 = arith.constant 0 : index
      %c0_40 = arith.constant 0 : index
      %c0_41 = arith.constant 0 : index
      %54 = vector.load %arg10[%c0_39, %c0_40, %c0_41] : memref<2x32x32xf32, #tpu.memory_space<vmem>>, vector<1x32x32xf32>
      %55 = vector.shape_cast %54 : vector<1x32x32xf32> to vector<32x32xf32>
      %c0_42 = arith.constant 0 : index
      %c0_43 = arith.constant 0 : index
      %c0_44 = arith.constant 0 : index
      %56 = vector.load %arg11[%c0_42, %c0_43, %c0_44] : memref<2x1x32xf32, #tpu.memory_space<vmem>>, vector<1x1x32xf32>
      %57 = vector.shape_cast %56 : vector<1x1x32xf32> to vector<1x32xf32>
      %c0_45 = arith.constant 0 : index
      %c0_46 = arith.constant 0 : index
      %c0_47 = arith.constant 0 : index
      %58 = vector.load %arg12[%c0_45, %c0_46, %c0_47] : memref<2x1x32xf32, #tpu.memory_space<vmem>>, vector<1x1x32xf32>
      %59 = vector.shape_cast %58 : vector<1x1x32xf32> to vector<1x32xf32>
      %cst_48 = arith.constant dense<0.000000e+00> : vector<8x32xf32>
      %60 = tpu.matmul %49, %55, %cst_48 {dimension_numbers = #tpu.dot_dimension_numbers<[1], [0], [0], [1], [0, 0, 1, 1], [], []>} : vector<8x32xf32>, vector<32x32xf32>, vector<8x32xf32> -> vector<8x32xf32>
      %cst_49 = arith.constant dense<0.000000e+00> : vector<8xf32>
      %61 = vector.multi_reduction <add>, %60, %cst_49 [1] : vector<8x32xf32> to vector<8xf32>
      %62 = vector.shape_cast %61 : vector<8xf32> to vector<8x1xf32>
      %cst_50 = arith.constant 3.200000e+01 : f32
      %63 = vector.broadcast %cst_50 : f32 to vector<8x1xf32>
      %64 = arith.divf %62, %63 : vector<8x1xf32>
      %65 = vector.broadcast %64 : vector<8x1xf32> to vector<8x32xf32>
      %66 = arith.subf %60, %65 : vector<8x32xf32>
      %67 = arith.mulf %66, %66 : vector<8x32xf32>
      %cst_51 = arith.constant dense<0.000000e+00> : vector<8xf32>
      %68 = vector.multi_reduction <add>, %67, %cst_51 [1] : vector<8x32xf32> to vector<8xf32>
      %69 = vector.shape_cast %68 : vector<8xf32> to vector<8x1xf32>
      %cst_52 = arith.constant 3.200000e+01 : f32
      %70 = vector.broadcast %cst_52 : f32 to vector<8x1xf32>
      %71 = arith.divf %69, %70 : vector<8x1xf32>
      %72 = vector.broadcast %64 : vector<8x1xf32> to vector<8x32xf32>
      %73 = arith.subf %60, %72 : vector<8x32xf32>
      %cst_53 = arith.constant 9.99999974E-6 : f32
      %74 = vector.broadcast %cst_53 : f32 to vector<8x1xf32>
      %75 = arith.addf %71, %74 : vector<8x1xf32>
      %76 = math.rsqrt %75 : vector<8x1xf32>
      %77 = vector.broadcast %76 : vector<8x1xf32> to vector<8x32xf32>
      %78 = arith.mulf %73, %77 : vector<8x32xf32>
      %79 = vector.broadcast %57 : vector<1x32xf32> to vector<8x32xf32>
      %80 = arith.mulf %78, %79 : vector<8x32xf32>
      %81 = vector.broadcast %59 : vector<1x32xf32> to vector<8x32xf32>
      %82 = arith.addf %80, %81 : vector<8x32xf32>
      %83 = arith.negf %82 : vector<8x32xf32>
      %84 = math.exp %83 : vector<8x32xf32>
      %cst_54 = arith.constant 1.000000e+00 : f32
      %85 = vector.broadcast %cst_54 : f32 to vector<8x32xf32>
      %86 = arith.addf %85, %84 : vector<8x32xf32>
      %87 = arith.divf %85, %86 : vector<8x32xf32>
      %88 = arith.mulf %87, %49 : vector<8x32xf32>
      %cst_55 = arith.constant 1.000000e+00 : f32
      %89 = vector.broadcast %cst_55 : f32 to vector<8x32xf32>
      %90 = arith.subf %89, %87 : vector<8x32xf32>
      %91 = arith.mulf %90, %53 : vector<8x32xf32>
      %92 = arith.addf %88, %91 : vector<8x32xf32>
      %c0_56 = arith.constant 0 : index
      %c0_57 = arith.constant 0 : index
      %c0_58 = arith.constant 0 : index
      %93 = vector.load %arg7[%c0_56, %c0_57, %c0_58] : memref<2x32x96xf32, #tpu.memory_space<vmem>>, vector<1x32x96xf32>
      %94 = vector.shape_cast %93 : vector<1x32x96xf32> to vector<32x96xf32>
      %c0_59 = arith.constant 0 : index
      %c0_60 = arith.constant 0 : index
      %c0_61 = arith.constant 0 : index
      %95 = vector.load %arg8[%c0_59, %c0_60, %c0_61] : memref<2x1x96xf32, #tpu.memory_space<vmem>>, vector<1x1x96xf32>
      %96 = vector.shape_cast %95 : vector<1x1x96xf32> to vector<1x96xf32>
      %c0_62 = arith.constant 0 : index
      %c0_63 = arith.constant 0 : index
      %c0_64 = arith.constant 0 : index
      %97 = vector.load %arg9[%c0_62, %c0_63, %c0_64] : memref<2x1x96xf32, #tpu.memory_space<vmem>>, vector<1x1x96xf32>
      %98 = vector.shape_cast %97 : vector<1x1x96xf32> to vector<1x96xf32>
      %cst_65 = arith.constant dense<0.000000e+00> : vector<8x96xf32>
      %99 = tpu.matmul %92, %94, %cst_65 {dimension_numbers = #tpu.dot_dimension_numbers<[1], [0], [0], [1], [0, 0, 1, 1], [], []>} : vector<8x32xf32>, vector<32x96xf32>, vector<8x96xf32> -> vector<8x96xf32>
      %cst_66 = arith.constant dense<0.000000e+00> : vector<8xf32>
      %100 = vector.multi_reduction <add>, %99, %cst_66 [1] : vector<8x96xf32> to vector<8xf32>
      %101 = vector.shape_cast %100 : vector<8xf32> to vector<8x1xf32>
      %cst_67 = arith.constant 9.600000e+01 : f32
      %102 = vector.broadcast %cst_67 : f32 to vector<8x1xf32>
      %103 = arith.divf %101, %102 : vector<8x1xf32>
      %104 = vector.broadcast %103 : vector<8x1xf32> to vector<8x96xf32>
      %105 = arith.subf %99, %104 : vector<8x96xf32>
      %106 = arith.mulf %105, %105 : vector<8x96xf32>
      %cst_68 = arith.constant dense<0.000000e+00> : vector<8xf32>
      %107 = vector.multi_reduction <add>, %106, %cst_68 [1] : vector<8x96xf32> to vector<8xf32>
      %108 = vector.shape_cast %107 : vector<8xf32> to vector<8x1xf32>
      %cst_69 = arith.constant 9.600000e+01 : f32
      %109 = vector.broadcast %cst_69 : f32 to vector<8x1xf32>
      %110 = arith.divf %108, %109 : vector<8x1xf32>
      %111 = vector.broadcast %103 : vector<8x1xf32> to vector<8x96xf32>
      %112 = arith.subf %99, %111 : vector<8x96xf32>
      %cst_70 = arith.constant 9.99999974E-6 : f32
      %113 = vector.broadcast %cst_70 : f32 to vector<8x1xf32>
      %114 = arith.addf %110, %113 : vector<8x1xf32>
      %115 = math.rsqrt %114 : vector<8x1xf32>
      %116 = vector.broadcast %115 : vector<8x1xf32> to vector<8x96xf32>
      %117 = arith.mulf %112, %116 : vector<8x96xf32>
      %118 = vector.broadcast %96 : vector<1x96xf32> to vector<8x96xf32>
      %119 = arith.mulf %117, %118 : vector<8x96xf32>
      %120 = vector.broadcast %98 : vector<1x96xf32> to vector<8x96xf32>
      %121 = arith.addf %119, %120 : vector<8x96xf32>
      %c0_71 = arith.constant 0 : index
      %c0_72 = arith.constant 0 : index
      %c0_73 = arith.constant 0 : index
      %122 = vector.load %arg13[%c0_71, %c0_72, %c0_73] : memref<2x32x96xf32, #tpu.memory_space<vmem>>, vector<1x32x96xf32>
      %123 = vector.shape_cast %122 : vector<1x32x96xf32> to vector<32x96xf32>
      %c0_74 = arith.constant 0 : index
      %c0_75 = arith.constant 0 : index
      %c0_76 = arith.constant 0 : index
      %124 = vector.load %arg14[%c0_74, %c0_75, %c0_76] : memref<2x1x96xf32, #tpu.memory_space<vmem>>, vector<1x1x96xf32>
      %125 = vector.shape_cast %124 : vector<1x1x96xf32> to vector<1x96xf32>
      %c0_77 = arith.constant 0 : index
      %c0_78 = arith.constant 0 : index
      %c0_79 = arith.constant 0 : index
      %126 = vector.load %arg15[%c0_77, %c0_78, %c0_79] : memref<2x1x96xf32, #tpu.memory_space<vmem>>, vector<1x1x96xf32>
      %127 = vector.shape_cast %126 : vector<1x1x96xf32> to vector<1x96xf32>
      %cst_80 = arith.constant dense<0.000000e+00> : vector<8x96xf32>
      %128 = tpu.matmul %37, %123, %cst_80 {dimension_numbers = #tpu.dot_dimension_numbers<[1], [0], [0], [1], [0, 0, 1, 1], [], []>} : vector<8x32xf32>, vector<32x96xf32>, vector<8x96xf32> -> vector<8x96xf32>
      %cst_81 = arith.constant dense<0.000000e+00> : vector<8xf32>
      %129 = vector.multi_reduction <add>, %128, %cst_81 [1] : vector<8x96xf32> to vector<8xf32>
      %130 = vector.shape_cast %129 : vector<8xf32> to vector<8x1xf32>
      %cst_82 = arith.constant 9.600000e+01 : f32
      %131 = vector.broadcast %cst_82 : f32 to vector<8x1xf32>
      %132 = arith.divf %130, %131 : vector<8x1xf32>
      %133 = vector.broadcast %132 : vector<8x1xf32> to vector<8x96xf32>
      %134 = arith.subf %128, %133 : vector<8x96xf32>
      %135 = arith.mulf %134, %134 : vector<8x96xf32>
      %cst_83 = arith.constant dense<0.000000e+00> : vector<8xf32>
      %136 = vector.multi_reduction <add>, %135, %cst_83 [1] : vector<8x96xf32> to vector<8xf32>
      %137 = vector.shape_cast %136 : vector<8xf32> to vector<8x1xf32>
      %cst_84 = arith.constant 9.600000e+01 : f32
      %138 = vector.broadcast %cst_84 : f32 to vector<8x1xf32>
      %139 = arith.divf %137, %138 : vector<8x1xf32>
      %140 = vector.broadcast %132 : vector<8x1xf32> to vector<8x96xf32>
      %141 = arith.subf %128, %140 : vector<8x96xf32>
      %cst_85 = arith.constant 9.99999974E-6 : f32
      %142 = vector.broadcast %cst_85 : f32 to vector<8x1xf32>
      %143 = arith.addf %139, %142 : vector<8x1xf32>
      %144 = math.rsqrt %143 : vector<8x1xf32>
      %145 = vector.broadcast %144 : vector<8x1xf32> to vector<8x96xf32>
      %146 = arith.mulf %141, %145 : vector<8x96xf32>
      %147 = vector.broadcast %125 : vector<1x96xf32> to vector<8x96xf32>
      %148 = arith.mulf %146, %147 : vector<8x96xf32>
      %149 = vector.broadcast %127 : vector<1x96xf32> to vector<8x96xf32>
      %150 = arith.addf %148, %149 : vector<8x96xf32>
      %151 = vector.extract_strided_slice %121 {offsets = [0, 0], sizes = [8, 32], strides = [1, 1]} : vector<8x96xf32> to vector<8x32xf32>
      %152 = vector.extract_strided_slice %121 {offsets = [0, 32], sizes = [8, 32], strides = [1, 1]} : vector<8x96xf32> to vector<8x32xf32>
      %153 = vector.extract_strided_slice %121 {offsets = [0, 64], sizes = [8, 32], strides = [1, 1]} : vector<8x96xf32> to vector<8x32xf32>
      %154 = vector.extract_strided_slice %150 {offsets = [0, 0], sizes = [8, 32], strides = [1, 1]} : vector<8x96xf32> to vector<8x32xf32>
      %155 = vector.extract_strided_slice %150 {offsets = [0, 32], sizes = [8, 32], strides = [1, 1]} : vector<8x96xf32> to vector<8x32xf32>
      %156 = vector.extract_strided_slice %150 {offsets = [0, 64], sizes = [8, 32], strides = [1, 1]} : vector<8x96xf32> to vector<8x32xf32>
      %157 = arith.negf %151 : vector<8x32xf32>
      %158 = math.exp %157 : vector<8x32xf32>
      %cst_86 = arith.constant 1.000000e+00 : f32
      %159 = vector.broadcast %cst_86 : f32 to vector<8x32xf32>
      %160 = arith.addf %159, %158 : vector<8x32xf32>
      %161 = arith.divf %159, %160 : vector<8x32xf32>
      %162 = arith.negf %154 : vector<8x32xf32>
      %163 = math.exp %162 : vector<8x32xf32>
      %cst_87 = arith.constant 1.000000e+00 : f32
      %164 = vector.broadcast %cst_87 : f32 to vector<8x32xf32>
      %165 = arith.addf %164, %163 : vector<8x32xf32>
      %166 = arith.divf %164, %165 : vector<8x32xf32>
      %167 = arith.mulf %161, %152 : vector<8x32xf32>
      %cst_88 = arith.constant 1.000000e+00 : f32
      %168 = vector.broadcast %cst_88 : f32 to vector<8x32xf32>
      %169 = arith.subf %168, %161 : vector<8x32xf32>
      %170 = arith.mulf %169, %155 : vector<8x32xf32>
      %171 = arith.addf %167, %170 : vector<8x32xf32>
      %172 = arith.mulf %166, %156 : vector<8x32xf32>
      %cst_89 = arith.constant 1.000000e+00 : f32
      %173 = vector.broadcast %cst_89 : f32 to vector<8x32xf32>
      %174 = arith.subf %173, %166 : vector<8x32xf32>
      %175 = arith.mulf %174, %153 : vector<8x32xf32>
      %176 = arith.addf %172, %175 : vector<8x32xf32>
      %c0_90 = arith.constant 0 : index
      %c0_91 = arith.constant 0 : index
      %c0_92 = arith.constant 0 : index
      %177 = vector.load %arg17[%c0_90, %c0_91, %c0_92] : memref<2x8x32xf32, #tpu.memory_space<vmem>>, vector<1x8x32xf32>
      %178 = vector.shape_cast %177 : vector<1x8x32xf32> to vector<8x32xf32>
      %179 = vector.shape_cast %171 : vector<8x32xf32> to vector<1x8x32xf32>
      tpu.vector_store %arg17[%c0_90, %c0_91, %c0_92], %179 {strides = array<i32>} : memref<2x8x32xf32, #tpu.memory_space<vmem>>, vector<1x8x32xf32>,
      %c0_i32_93 = arith.constant 0 : i32
      %180 = arith.addi %c0_i32_93, %47 : i32
      %181 = arith.index_cast %180 : i32 to index
      %c0_94 = arith.constant 0 : index
      %c0_95 = arith.constant 0 : index
      %182 = vector.load %arg18[%181, %c0_94, %c0_95] : memref<8x8x32xf32, #tpu.memory_space<vmem>>, vector<1x8x32xf32>
      %183 = vector.shape_cast %182 : vector<1x8x32xf32> to vector<8x32xf32>
      %184 = vector.shape_cast %171 : vector<8x32xf32> to vector<1x8x32xf32>
      tpu.vector_store %arg18[%181, %c0_94, %c0_95], %184 {strides = array<i32>} : memref<8x8x32xf32, #tpu.memory_space<vmem>>, vector<1x8x32xf32>,
      %c1 = arith.constant 1 : index
      %c0_96 = arith.constant 0 : index
      %c0_97 = arith.constant 0 : index
      %185 = vector.load %arg17[%c1, %c0_96, %c0_97] : memref<2x8x32xf32, #tpu.memory_space<vmem>>, vector<1x8x32xf32>
      %186 = vector.shape_cast %185 : vector<1x8x32xf32> to vector<8x32xf32>
      %c4 = arith.constant 4 : index
      %c0_98 = arith.constant 0 : index
      %c0_99 = arith.constant 0 : index
      %187 = vector.load %arg18[%c4, %c0_98, %c0_99] : memref<8x8x32xf32, #tpu.memory_space<vmem>>, vector<4x8x32xf32>
      %cst_100 = arith.constant dense<0.000000e+00> : vector<8x32xf32>
      %188 = vector.multi_reduction <add>, %187, %cst_100 [0] : vector<4x8x32xf32> to vector<8x32xf32>
      %cst_101 = arith.constant 2.500000e-01 : f32
      %189 = vector.broadcast %cst_101 : f32 to vector<8x32xf32>
      %190 = arith.mulf %188, %189 : vector<8x32xf32>
      %c1_102 = arith.constant 1 : index
      %c0_103 = arith.constant 0 : index
      %c0_104 = arith.constant 0 : index
      %191 = vector.load %arg10[%c1_102, %c0_103, %c0_104] : memref<2x32x32xf32, #tpu.memory_space<vmem>>, vector<1x32x32xf32>
      %192 = vector.shape_cast %191 : vector<1x32x32xf32> to vector<32x32xf32>
      %c1_105 = arith.constant 1 : index
      %c0_106 = arith.constant 0 : index
      %c0_107 = arith.constant 0 : index
      %193 = vector.load %arg11[%c1_105, %c0_106, %c0_107] : memref<2x1x32xf32, #tpu.memory_space<vmem>>, vector<1x1x32xf32>
      %194 = vector.shape_cast %193 : vector<1x1x32xf32> to vector<1x32xf32>
      %c1_108 = arith.constant 1 : index
      %c0_109 = arith.constant 0 : index
      %c0_110 = arith.constant 0 : index
      %195 = vector.load %arg12[%c1_108, %c0_109, %c0_110] : memref<2x1x32xf32, #tpu.memory_space<vmem>>, vector<1x1x32xf32>
      %196 = vector.shape_cast %195 : vector<1x1x32xf32> to vector<1x32xf32>
      %cst_111 = arith.constant dense<0.000000e+00> : vector<8x32xf32>
      %197 = tpu.matmul %186, %192, %cst_111 {dimension_numbers = #tpu.dot_dimension_numbers<[1], [0], [0], [1], [0, 0, 1, 1], [], []>} : vector<8x32xf32>, vector<32x32xf32>, vector<8x32xf32> -> vector<8x32xf32>
      %cst_112 = arith.constant dense<0.000000e+00> : vector<8xf32>
      %198 = vector.multi_reduction <add>, %197, %cst_112 [1] : vector<8x32xf32> to vector<8xf32>
      %199 = vector.shape_cast %198 : vector<8xf32> to vector<8x1xf32>
      %cst_113 = arith.constant 3.200000e+01 : f32
      %200 = vector.broadcast %cst_113 : f32 to vector<8x1xf32>
      %201 = arith.divf %199, %200 : vector<8x1xf32>
      %202 = vector.broadcast %201 : vector<8x1xf32> to vector<8x32xf32>
      %203 = arith.subf %197, %202 : vector<8x32xf32>
      %204 = arith.mulf %203, %203 : vector<8x32xf32>
      %cst_114 = arith.constant dense<0.000000e+00> : vector<8xf32>
      %205 = vector.multi_reduction <add>, %204, %cst_114 [1] : vector<8x32xf32> to vector<8xf32>
      %206 = vector.shape_cast %205 : vector<8xf32> to vector<8x1xf32>
      %cst_115 = arith.constant 3.200000e+01 : f32
      %207 = vector.broadcast %cst_115 : f32 to vector<8x1xf32>
      %208 = arith.divf %206, %207 : vector<8x1xf32>
      %209 = vector.broadcast %201 : vector<8x1xf32> to vector<8x32xf32>
      %210 = arith.subf %197, %209 : vector<8x32xf32>
      %cst_116 = arith.constant 9.99999974E-6 : f32
      %211 = vector.broadcast %cst_116 : f32 to vector<8x1xf32>
      %212 = arith.addf %208, %211 : vector<8x1xf32>
      %213 = math.rsqrt %212 : vector<8x1xf32>
      %214 = vector.broadcast %213 : vector<8x1xf32> to vector<8x32xf32>
      %215 = arith.mulf %210, %214 : vector<8x32xf32>
      %216 = vector.broadcast %194 : vector<1x32xf32> to vector<8x32xf32>
      %217 = arith.mulf %215, %216 : vector<8x32xf32>
      %218 = vector.broadcast %196 : vector<1x32xf32> to vector<8x32xf32>
      %219 = arith.addf %217, %218 : vector<8x32xf32>
      %220 = arith.negf %219 : vector<8x32xf32>
      %221 = math.exp %220 : vector<8x32xf32>
      %cst_117 = arith.constant 1.000000e+00 : f32
      %222 = vector.broadcast %cst_117 : f32 to vector<8x32xf32>
      %223 = arith.addf %222, %221 : vector<8x32xf32>
      %224 = arith.divf %222, %223 : vector<8x32xf32>
      %225 = arith.mulf %224, %186 : vector<8x32xf32>
      %cst_118 = arith.constant 1.000000e+00 : f32
      %226 = vector.broadcast %cst_118 : f32 to vector<8x32xf32>
      %227 = arith.subf %226, %224 : vector<8x32xf32>
      %228 = arith.mulf %227, %190 : vector<8x32xf32>
      %229 = arith.addf %225, %228 : vector<8x32xf32>
      %c1_119 = arith.constant 1 : index
      %c0_120 = arith.constant 0 : index
      %c0_121 = arith.constant 0 : index
      %230 = vector.load %arg7[%c1_119, %c0_120, %c0_121] : memref<2x32x96xf32, #tpu.memory_space<vmem>>, vector<1x32x96xf32>
      %231 = vector.shape_cast %230 : vector<1x32x96xf32> to vector<32x96xf32>
      %c1_122 = arith.constant 1 : index
      %c0_123 = arith.constant 0 : index
      %c0_124 = arith.constant 0 : index
      %232 = vector.load %arg8[%c1_122, %c0_123, %c0_124] : memref<2x1x96xf32, #tpu.memory_space<vmem>>, vector<1x1x96xf32>
      %233 = vector.shape_cast %232 : vector<1x1x96xf32> to vector<1x96xf32>
      %c1_125 = arith.constant 1 : index
      %c0_126 = arith.constant 0 : index
      %c0_127 = arith.constant 0 : index
      %234 = vector.load %arg9[%c1_125, %c0_126, %c0_127] : memref<2x1x96xf32, #tpu.memory_space<vmem>>, vector<1x1x96xf32>
      %235 = vector.shape_cast %234 : vector<1x1x96xf32> to vector<1x96xf32>
      %cst_128 = arith.constant dense<0.000000e+00> : vector<8x96xf32>
      %236 = tpu.matmul %229, %231, %cst_128 {dimension_numbers = #tpu.dot_dimension_numbers<[1], [0], [0], [1], [0, 0, 1, 1], [], []>} : vector<8x32xf32>, vector<32x96xf32>, vector<8x96xf32> -> vector<8x96xf32>
      %cst_129 = arith.constant dense<0.000000e+00> : vector<8xf32>
      %237 = vector.multi_reduction <add>, %236, %cst_129 [1] : vector<8x96xf32> to vector<8xf32>
      %238 = vector.shape_cast %237 : vector<8xf32> to vector<8x1xf32>
      %cst_130 = arith.constant 9.600000e+01 : f32
      %239 = vector.broadcast %cst_130 : f32 to vector<8x1xf32>
      %240 = arith.divf %238, %239 : vector<8x1xf32>
      %241 = vector.broadcast %240 : vector<8x1xf32> to vector<8x96xf32>
      %242 = arith.subf %236, %241 : vector<8x96xf32>
      %243 = arith.mulf %242, %242 : vector<8x96xf32>
      %cst_131 = arith.constant dense<0.000000e+00> : vector<8xf32>
      %244 = vector.multi_reduction <add>, %243, %cst_131 [1] : vector<8x96xf32> to vector<8xf32>
      %245 = vector.shape_cast %244 : vector<8xf32> to vector<8x1xf32>
      %cst_132 = arith.constant 9.600000e+01 : f32
      %246 = vector.broadcast %cst_132 : f32 to vector<8x1xf32>
      %247 = arith.divf %245, %246 : vector<8x1xf32>
      %248 = vector.broadcast %240 : vector<8x1xf32> to vector<8x96xf32>
      %249 = arith.subf %236, %248 : vector<8x96xf32>
      %cst_133 = arith.constant 9.99999974E-6 : f32
      %250 = vector.broadcast %cst_133 : f32 to vector<8x1xf32>
      %251 = arith.addf %247, %250 : vector<8x1xf32>
      %252 = math.rsqrt %251 : vector<8x1xf32>
      %253 = vector.broadcast %252 : vector<8x1xf32> to vector<8x96xf32>
      %254 = arith.mulf %249, %253 : vector<8x96xf32>
      %255 = vector.broadcast %233 : vector<1x96xf32> to vector<8x96xf32>
      %256 = arith.mulf %254, %255 : vector<8x96xf32>
      %257 = vector.broadcast %235 : vector<1x96xf32> to vector<8x96xf32>
      %258 = arith.addf %256, %257 : vector<8x96xf32>
      %c1_134 = arith.constant 1 : index
      %c0_135 = arith.constant 0 : index
      %c0_136 = arith.constant 0 : index
      %259 = vector.load %arg13[%c1_134, %c0_135, %c0_136] : memref<2x32x96xf32, #tpu.memory_space<vmem>>, vector<1x32x96xf32>
      %260 = vector.shape_cast %259 : vector<1x32x96xf32> to vector<32x96xf32>
      %c1_137 = arith.constant 1 : index
      %c0_138 = arith.constant 0 : index
      %c0_139 = arith.constant 0 : index
      %261 = vector.load %arg14[%c1_137, %c0_138, %c0_139] : memref<2x1x96xf32, #tpu.memory_space<vmem>>, vector<1x1x96xf32>
      %262 = vector.shape_cast %261 : vector<1x1x96xf32> to vector<1x96xf32>
      %c1_140 = arith.constant 1 : index
      %c0_141 = arith.constant 0 : index
      %c0_142 = arith.constant 0 : index
      %263 = vector.load %arg15[%c1_140, %c0_141, %c0_142] : memref<2x1x96xf32, #tpu.memory_space<vmem>>, vector<1x1x96xf32>
      %264 = vector.shape_cast %263 : vector<1x1x96xf32> to vector<1x96xf32>
      %cst_143 = arith.constant dense<0.000000e+00> : vector<8x96xf32>
      %265 = tpu.matmul %176, %260, %cst_143 {dimension_numbers = #tpu.dot_dimension_numbers<[1], [0], [0], [1], [0, 0, 1, 1], [], []>} : vector<8x32xf32>, vector<32x96xf32>, vector<8x96xf32> -> vector<8x96xf32>
      %cst_144 = arith.constant dense<0.000000e+00> : vector<8xf32>
      %266 = vector.multi_reduction <add>, %265, %cst_144 [1] : vector<8x96xf32> to vector<8xf32>
      %267 = vector.shape_cast %266 : vector<8xf32> to vector<8x1xf32>
      %cst_145 = arith.constant 9.600000e+01 : f32
      %268 = vector.broadcast %cst_145 : f32 to vector<8x1xf32>
      %269 = arith.divf %267, %268 : vector<8x1xf32>
      %270 = vector.broadcast %269 : vector<8x1xf32> to vector<8x96xf32>
      %271 = arith.subf %265, %270 : vector<8x96xf32>
      %272 = arith.mulf %271, %271 : vector<8x96xf32>
      %cst_146 = arith.constant dense<0.000000e+00> : vector<8xf32>
      %273 = vector.multi_reduction <add>, %272, %cst_146 [1] : vector<8x96xf32> to vector<8xf32>
      %274 = vector.shape_cast %273 : vector<8xf32> to vector<8x1xf32>
      %cst_147 = arith.constant 9.600000e+01 : f32
      %275 = vector.broadcast %cst_147 : f32 to vector<8x1xf32>
      %276 = arith.divf %274, %275 : vector<8x1xf32>
      %277 = vector.broadcast %269 : vector<8x1xf32> to vector<8x96xf32>
      %278 = arith.subf %265, %277 : vector<8x96xf32>
      %cst_148 = arith.constant 9.99999974E-6 : f32
      %279 = vector.broadcast %cst_148 : f32 to vector<8x1xf32>
      %280 = arith.addf %276, %279 : vector<8x1xf32>
      %281 = math.rsqrt %280 : vector<8x1xf32>
      %282 = vector.broadcast %281 : vector<8x1xf32> to vector<8x96xf32>
      %283 = arith.mulf %278, %282 : vector<8x96xf32>
      %284 = vector.broadcast %262 : vector<1x96xf32> to vector<8x96xf32>
      %285 = arith.mulf %283, %284 : vector<8x96xf32>
      %286 = vector.broadcast %264 : vector<1x96xf32> to vector<8x96xf32>
      %287 = arith.addf %285, %286 : vector<8x96xf32>
      %288 = vector.extract_strided_slice %258 {offsets = [0, 0], sizes = [8, 32], strides = [1, 1]} : vector<8x96xf32> to vector<8x32xf32>
      %289 = vector.extract_strided_slice %258 {offsets = [0, 32], sizes = [8, 32], strides = [1, 1]} : vector<8x96xf32> to vector<8x32xf32>
      %290 = vector.extract_strided_slice %258 {offsets = [0, 64], sizes = [8, 32], strides = [1, 1]} : vector<8x96xf32> to vector<8x32xf32>
      %291 = vector.extract_strided_slice %287 {offsets = [0, 0], sizes = [8, 32], strides = [1, 1]} : vector<8x96xf32> to vector<8x32xf32>
      %292 = vector.extract_strided_slice %287 {offsets = [0, 32], sizes = [8, 32], strides = [1, 1]} : vector<8x96xf32> to vector<8x32xf32>
      %293 = vector.extract_strided_slice %287 {offsets = [0, 64], sizes = [8, 32], strides = [1, 1]} : vector<8x96xf32> to vector<8x32xf32>
      %294 = arith.negf %288 : vector<8x32xf32>
      %295 = math.exp %294 : vector<8x32xf32>
      %cst_149 = arith.constant 1.000000e+00 : f32
      %296 = vector.broadcast %cst_149 : f32 to vector<8x32xf32>
      %297 = arith.addf %296, %295 : vector<8x32xf32>
      %298 = arith.divf %296, %297 : vector<8x32xf32>
      %299 = arith.negf %291 : vector<8x32xf32>
      %300 = math.exp %299 : vector<8x32xf32>
      %cst_150 = arith.constant 1.000000e+00 : f32
      %301 = vector.broadcast %cst_150 : f32 to vector<8x32xf32>
      %302 = arith.addf %301, %300 : vector<8x32xf32>
      %303 = arith.divf %301, %302 : vector<8x32xf32>
      %304 = arith.mulf %298, %289 : vector<8x32xf32>
      %cst_151 = arith.constant 1.000000e+00 : f32
      %305 = vector.broadcast %cst_151 : f32 to vector<8x32xf32>
      %306 = arith.subf %305, %298 : vector<8x32xf32>
      %307 = arith.mulf %306, %292 : vector<8x32xf32>
      %308 = arith.addf %304, %307 : vector<8x32xf32>
      %309 = arith.mulf %303, %293 : vector<8x32xf32>
      %cst_152 = arith.constant 1.000000e+00 : f32
      %310 = vector.broadcast %cst_152 : f32 to vector<8x32xf32>
      %311 = arith.subf %310, %303 : vector<8x32xf32>
      %312 = arith.mulf %311, %290 : vector<8x32xf32>
      %313 = arith.addf %309, %312 : vector<8x32xf32>
      %c1_153 = arith.constant 1 : index
      %c0_154 = arith.constant 0 : index
      %c0_155 = arith.constant 0 : index
      %314 = vector.load %arg17[%c1_153, %c0_154, %c0_155] : memref<2x8x32xf32, #tpu.memory_space<vmem>>, vector<1x8x32xf32>
      %315 = vector.shape_cast %314 : vector<1x8x32xf32> to vector<8x32xf32>
      %316 = vector.shape_cast %308 : vector<8x32xf32> to vector<1x8x32xf32>
      tpu.vector_store %arg17[%c1_153, %c0_154, %c0_155], %316 {strides = array<i32>} : memref<2x8x32xf32, #tpu.memory_space<vmem>>, vector<1x8x32xf32>,
      %c4_i32_156 = arith.constant 4 : i32
      %317 = arith.addi %c4_i32_156, %47 : i32
      %318 = arith.index_cast %317 : i32 to index
      %c0_157 = arith.constant 0 : index
      %c0_158 = arith.constant 0 : index
      %319 = vector.load %arg18[%318, %c0_157, %c0_158] : memref<8x8x32xf32, #tpu.memory_space<vmem>>, vector<1x8x32xf32>
      %320 = vector.shape_cast %319 : vector<1x8x32xf32> to vector<8x32xf32>
      %321 = vector.shape_cast %308 : vector<8x32xf32> to vector<1x8x32xf32>
      tpu.vector_store %arg18[%318, %c0_157, %c0_158], %321 {strides = array<i32>} : memref<8x8x32xf32, #tpu.memory_space<vmem>>, vector<1x8x32xf32>,
      %322 = arith.addf %313, %37 : vector<8x32xf32>
      %c0_159 = arith.constant 0 : index
      %c0_160 = arith.constant 0 : index
      %323 = vector.load %arg6[%c0_159, %c0_160] : memref<32x16xf32, #tpu.memory_space<vmem>>, vector<32x16xf32>
      %cst_161 = arith.constant dense<0.000000e+00> : vector<8x16xf32>
      %324 = tpu.matmul %322, %323, %cst_161 {dimension_numbers = #tpu.dot_dimension_numbers<[1], [0], [0], [1], [0, 0, 1, 1], [], []>} : vector<8x32xf32>, vector<32x16xf32>, vector<8x16xf32> -> vector<8x16xf32>
      %325 = arith.index_cast %arg19 : i32 to index
      %c0_162 = arith.constant 0 : index
      %c0_163 = arith.constant 0 : index
      %326 = vector.load %arg16[%325, %c0_162, %c0_163] : memref<7x8x16xf32, #tpu.memory_space<vmem>>, vector<1x8x16xf32>
      %327 = vector.shape_cast %326 : vector<1x8x16xf32> to vector<8x16xf32>
      %328 = vector.shape_cast %324 : vector<8x16xf32> to vector<1x8x16xf32>
      tpu.vector_store %arg16[%325, %c0_162, %c0_163], %328 {strides = array<i32>} : memref<7x8x16xf32, #tpu.memory_space<vmem>>, vector<1x8x16xf32>,
      scf.yield %324 : vector<8x16xf32>
    }
    %c4_i32_7 = arith.constant 4 : i32
    %c4_i32_8 = arith.constant 4 : i32
    %c3_i32 = arith.constant 3 : i32
    %7 = arith.addi %c4_i32_8, %c3_i32 : i32
    %c1_i32_9 = arith.constant 1 : i32
    %8 = scf.for %arg19 = %c4_i32_8 to %7 step %c1_i32_9 iter_args(%arg20 = %6) -> (vector<8x16xf32>)  : i32 {
      %c4_i32_11 = arith.constant 4 : i32
      %9 = arith.subi %arg19, %c4_i32_11 : i32
      %10 = arith.index_cast %9 : i32 to index
      %c0_12 = arith.constant 0 : index
      %c0_13 = arith.constant 0 : index
      %11 = vector.load %arg2[%10, %c0_12, %c0_13] : memref<3x8x16xf32, #tpu.memory_space<vmem>>, vector<1x8x16xf32>
      %12 = vector.shape_cast %11 : vector<1x8x16xf32> to vector<8x16xf32>
      %13 = arith.index_cast %arg19 : i32 to index
      %c0_14 = arith.constant 0 : index
      %c0_15 = arith.constant 0 : index
      %14 = vector.load %arg1[%13, %c0_14, %c0_15] : memref<8x8x16xf32, #tpu.memory_space<vmem>>, vector<1x8x16xf32>
      %15 = vector.shape_cast %14 : vector<1x8x16xf32> to vector<8x16xf32>
      %16 = arith.mulf %12, %15 : vector<8x16xf32>
      %cst_16 = arith.constant 1.000000e+00 : f32
      %17 = vector.broadcast %cst_16 : f32 to vector<8x16xf32>
      %18 = arith.subf %17, %12 : vector<8x16xf32>
      %19 = arith.mulf %18, %arg20 : vector<8x16xf32>
      %20 = arith.addf %16, %19 : vector<8x16xf32>
      %c0_17 = arith.constant 0 : index
      %c0_18 = arith.constant 0 : index
      %21 = vector.load %arg3[%c0_17, %c0_18] : memref<16x32xf32, #tpu.memory_space<vmem>>, vector<16x32xf32>
      %c0_19 = arith.constant 0 : index
      %c0_20 = arith.constant 0 : index
      %22 = vector.load %arg4[%c0_19, %c0_20] : memref<1x32xf32, #tpu.memory_space<vmem>>, vector<1x32xf32>
      %c0_21 = arith.constant 0 : index
      %c0_22 = arith.constant 0 : index
      %23 = vector.load %arg5[%c0_21, %c0_22] : memref<1x32xf32, #tpu.memory_space<vmem>>, vector<1x32xf32>
      %cst_23 = arith.constant dense<0.000000e+00> : vector<8x32xf32>
      %24 = tpu.matmul %20, %21, %cst_23 {dimension_numbers = #tpu.dot_dimension_numbers<[1], [0], [0], [1], [0, 0, 1, 1], [], []>} : vector<8x16xf32>, vector<16x32xf32>, vector<8x32xf32> -> vector<8x32xf32>
      %cst_24 = arith.constant dense<0.000000e+00> : vector<8xf32>
      %25 = vector.multi_reduction <add>, %24, %cst_24 [1] : vector<8x32xf32> to vector<8xf32>
      %26 = vector.shape_cast %25 : vector<8xf32> to vector<8x1xf32>
      %cst_25 = arith.constant 3.200000e+01 : f32
      %27 = vector.broadcast %cst_25 : f32 to vector<8x1xf32>
      %28 = arith.divf %26, %27 : vector<8x1xf32>
      %29 = vector.broadcast %28 : vector<8x1xf32> to vector<8x32xf32>
      %30 = arith.subf %24, %29 : vector<8x32xf32>
      %31 = arith.mulf %30, %30 : vector<8x32xf32>
      %cst_26 = arith.constant dense<0.000000e+00> : vector<8xf32>
      %32 = vector.multi_reduction <add>, %31, %cst_26 [1] : vector<8x32xf32> to vector<8xf32>
      %33 = vector.shape_cast %32 : vector<8xf32> to vector<8x1xf32>
      %cst_27 = arith.constant 3.200000e+01 : f32
      %34 = vector.broadcast %cst_27 : f32 to vector<8x1xf32>
      %35 = arith.divf %33, %34 : vector<8x1xf32>
      %36 = vector.broadcast %28 : vector<8x1xf32> to vector<8x32xf32>
      %37 = arith.subf %24, %36 : vector<8x32xf32>
      %cst_28 = arith.constant 9.99999974E-6 : f32
      %38 = vector.broadcast %cst_28 : f32 to vector<8x1xf32>
      %39 = arith.addf %35, %38 : vector<8x1xf32>
      %40 = math.rsqrt %39 : vector<8x1xf32>
      %41 = vector.broadcast %40 : vector<8x1xf32> to vector<8x32xf32>
      %42 = arith.mulf %37, %41 : vector<8x32xf32>
      %43 = vector.broadcast %22 : vector<1x32xf32> to vector<8x32xf32>
      %44 = arith.mulf %42, %43 : vector<8x32xf32>
      %45 = vector.broadcast %23 : vector<1x32xf32> to vector<8x32xf32>
      %46 = arith.addf %44, %45 : vector<8x32xf32>
      %c4_i32_29 = arith.constant 4 : i32
      %c0_i32_30 = arith.constant 0 : i32
      %47 = arith.cmpi eq, %c4_i32_29, %c0_i32_30 : i32
      %c1_i32_31 = arith.constant 1 : i32
      %48 = arith.select %47, %c1_i32_31, %c4_i32_29 : i32
      %49 = arith.remsi %arg19, %48 : i32
      %c0_i32_32 = arith.constant 0 : i32
      %50 = arith.cmpi ne, %49, %c0_i32_32 : i32
      %c0_i32_33 = arith.constant 0 : i32
      %51 = arith.cmpi slt, %49, %c0_i32_33 : i32
      %c0_i32_34 = arith.constant 0 : i32
      %52 = arith.cmpi slt, %48, %c0_i32_34 : i32
      %53 = arith.xori %51, %52 : i1
      %54 = arith.andi %53, %50 : i1
      %55 = arith.addi %49, %48 : i32
      %56 = arith.select %54, %55, %49 : i32
      %c0_35 = arith.constant 0 : index
      %c0_36 = arith.constant 0 : index
      %c0_37 = arith.constant 0 : index
      %57 = vector.load %arg17[%c0_35, %c0_36, %c0_37] : memref<2x8x32xf32, #tpu.memory_space<vmem>>, vector<1x8x32xf32>
      %58 = vector.shape_cast %57 : vector<1x8x32xf32> to vector<8x32xf32>
      %c0_38 = arith.constant 0 : index
      %c0_39 = arith.constant 0 : index
      %c0_40 = arith.constant 0 : index
      %59 = vector.load %arg18[%c0_38, %c0_39, %c0_40] : memref<8x8x32xf32, #tpu.memory_space<vmem>>, vector<4x8x32xf32>
      %cst_41 = arith.constant dense<0.000000e+00> : vector<8x32xf32>
      %60 = vector.multi_reduction <add>, %59, %cst_41 [0] : vector<4x8x32xf32> to vector<8x32xf32>
      %cst_42 = arith.constant 2.500000e-01 : f32
      %61 = vector.broadcast %cst_42 : f32 to vector<8x32xf32>
      %62 = arith.mulf %60, %61 : vector<8x32xf32>
      %c0_43 = arith.constant 0 : index
      %c0_44 = arith.constant 0 : index
      %c0_45 = arith.constant 0 : index
      %63 = vector.load %arg10[%c0_43, %c0_44, %c0_45] : memref<2x32x32xf32, #tpu.memory_space<vmem>>, vector<1x32x32xf32>
      %64 = vector.shape_cast %63 : vector<1x32x32xf32> to vector<32x32xf32>
      %c0_46 = arith.constant 0 : index
      %c0_47 = arith.constant 0 : index
      %c0_48 = arith.constant 0 : index
      %65 = vector.load %arg11[%c0_46, %c0_47, %c0_48] : memref<2x1x32xf32, #tpu.memory_space<vmem>>, vector<1x1x32xf32>
      %66 = vector.shape_cast %65 : vector<1x1x32xf32> to vector<1x32xf32>
      %c0_49 = arith.constant 0 : index
      %c0_50 = arith.constant 0 : index
      %c0_51 = arith.constant 0 : index
      %67 = vector.load %arg12[%c0_49, %c0_50, %c0_51] : memref<2x1x32xf32, #tpu.memory_space<vmem>>, vector<1x1x32xf32>
      %68 = vector.shape_cast %67 : vector<1x1x32xf32> to vector<1x32xf32>
      %cst_52 = arith.constant dense<0.000000e+00> : vector<8x32xf32>
      %69 = tpu.matmul %58, %64, %cst_52 {dimension_numbers = #tpu.dot_dimension_numbers<[1], [0], [0], [1], [0, 0, 1, 1], [], []>} : vector<8x32xf32>, vector<32x32xf32>, vector<8x32xf32> -> vector<8x32xf32>
      %cst_53 = arith.constant dense<0.000000e+00> : vector<8xf32>
      %70 = vector.multi_reduction <add>, %69, %cst_53 [1] : vector<8x32xf32> to vector<8xf32>
      %71 = vector.shape_cast %70 : vector<8xf32> to vector<8x1xf32>
      %cst_54 = arith.constant 3.200000e+01 : f32
      %72 = vector.broadcast %cst_54 : f32 to vector<8x1xf32>
      %73 = arith.divf %71, %72 : vector<8x1xf32>
      %74 = vector.broadcast %73 : vector<8x1xf32> to vector<8x32xf32>
      %75 = arith.subf %69, %74 : vector<8x32xf32>
      %76 = arith.mulf %75, %75 : vector<8x32xf32>
      %cst_55 = arith.constant dense<0.000000e+00> : vector<8xf32>
      %77 = vector.multi_reduction <add>, %76, %cst_55 [1] : vector<8x32xf32> to vector<8xf32>
      %78 = vector.shape_cast %77 : vector<8xf32> to vector<8x1xf32>
      %cst_56 = arith.constant 3.200000e+01 : f32
      %79 = vector.broadcast %cst_56 : f32 to vector<8x1xf32>
      %80 = arith.divf %78, %79 : vector<8x1xf32>
      %81 = vector.broadcast %73 : vector<8x1xf32> to vector<8x32xf32>
      %82 = arith.subf %69, %81 : vector<8x32xf32>
      %cst_57 = arith.constant 9.99999974E-6 : f32
      %83 = vector.broadcast %cst_57 : f32 to vector<8x1xf32>
      %84 = arith.addf %80, %83 : vector<8x1xf32>
      %85 = math.rsqrt %84 : vector<8x1xf32>
      %86 = vector.broadcast %85 : vector<8x1xf32> to vector<8x32xf32>
      %87 = arith.mulf %82, %86 : vector<8x32xf32>
      %88 = vector.broadcast %66 : vector<1x32xf32> to vector<8x32xf32>
      %89 = arith.mulf %87, %88 : vector<8x32xf32>
      %90 = vector.broadcast %68 : vector<1x32xf32> to vector<8x32xf32>
      %91 = arith.addf %89, %90 : vector<8x32xf32>
      %92 = arith.negf %91 : vector<8x32xf32>
      %93 = math.exp %92 : vector<8x32xf32>
      %cst_58 = arith.constant 1.000000e+00 : f32
      %94 = vector.broadcast %cst_58 : f32 to vector<8x32xf32>
      %95 = arith.addf %94, %93 : vector<8x32xf32>
      %96 = arith.divf %94, %95 : vector<8x32xf32>
      %97 = arith.mulf %96, %58 : vector<8x32xf32>
      %cst_59 = arith.constant 1.000000e+00 : f32
      %98 = vector.broadcast %cst_59 : f32 to vector<8x32xf32>
      %99 = arith.subf %98, %96 : vector<8x32xf32>
      %100 = arith.mulf %99, %62 : vector<8x32xf32>
      %101 = arith.addf %97, %100 : vector<8x32xf32>
      %c0_60 = arith.constant 0 : index
      %c0_61 = arith.constant 0 : index
      %c0_62 = arith.constant 0 : index
      %102 = vector.load %arg7[%c0_60, %c0_61, %c0_62] : memref<2x32x96xf32, #tpu.memory_space<vmem>>, vector<1x32x96xf32>
      %103 = vector.shape_cast %102 : vector<1x32x96xf32> to vector<32x96xf32>
      %c0_63 = arith.constant 0 : index
      %c0_64 = arith.constant 0 : index
      %c0_65 = arith.constant 0 : index
      %104 = vector.load %arg8[%c0_63, %c0_64, %c0_65] : memref<2x1x96xf32, #tpu.memory_space<vmem>>, vector<1x1x96xf32>
      %105 = vector.shape_cast %104 : vector<1x1x96xf32> to vector<1x96xf32>
      %c0_66 = arith.constant 0 : index
      %c0_67 = arith.constant 0 : index
      %c0_68 = arith.constant 0 : index
      %106 = vector.load %arg9[%c0_66, %c0_67, %c0_68] : memref<2x1x96xf32, #tpu.memory_space<vmem>>, vector<1x1x96xf32>
      %107 = vector.shape_cast %106 : vector<1x1x96xf32> to vector<1x96xf32>
      %cst_69 = arith.constant dense<0.000000e+00> : vector<8x96xf32>
      %108 = tpu.matmul %101, %103, %cst_69 {dimension_numbers = #tpu.dot_dimension_numbers<[1], [0], [0], [1], [0, 0, 1, 1], [], []>} : vector<8x32xf32>, vector<32x96xf32>, vector<8x96xf32> -> vector<8x96xf32>
      %cst_70 = arith.constant dense<0.000000e+00> : vector<8xf32>
      %109 = vector.multi_reduction <add>, %108, %cst_70 [1] : vector<8x96xf32> to vector<8xf32>
      %110 = vector.shape_cast %109 : vector<8xf32> to vector<8x1xf32>
      %cst_71 = arith.constant 9.600000e+01 : f32
      %111 = vector.broadcast %cst_71 : f32 to vector<8x1xf32>
      %112 = arith.divf %110, %111 : vector<8x1xf32>
      %113 = vector.broadcast %112 : vector<8x1xf32> to vector<8x96xf32>
      %114 = arith.subf %108, %113 : vector<8x96xf32>
      %115 = arith.mulf %114, %114 : vector<8x96xf32>
      %cst_72 = arith.constant dense<0.000000e+00> : vector<8xf32>
      %116 = vector.multi_reduction <add>, %115, %cst_72 [1] : vector<8x96xf32> to vector<8xf32>
      %117 = vector.shape_cast %116 : vector<8xf32> to vector<8x1xf32>
      %cst_73 = arith.constant 9.600000e+01 : f32
      %118 = vector.broadcast %cst_73 : f32 to vector<8x1xf32>
      %119 = arith.divf %117, %118 : vector<8x1xf32>
      %120 = vector.broadcast %112 : vector<8x1xf32> to vector<8x96xf32>
      %121 = arith.subf %108, %120 : vector<8x96xf32>
      %cst_74 = arith.constant 9.99999974E-6 : f32
      %122 = vector.broadcast %cst_74 : f32 to vector<8x1xf32>
      %123 = arith.addf %119, %122 : vector<8x1xf32>
      %124 = math.rsqrt %123 : vector<8x1xf32>
      %125 = vector.broadcast %124 : vector<8x1xf32> to vector<8x96xf32>
      %126 = arith.mulf %121, %125 : vector<8x96xf32>
      %127 = vector.broadcast %105 : vector<1x96xf32> to vector<8x96xf32>
      %128 = arith.mulf %126, %127 : vector<8x96xf32>
      %129 = vector.broadcast %107 : vector<1x96xf32> to vector<8x96xf32>
      %130 = arith.addf %128, %129 : vector<8x96xf32>
      %c0_75 = arith.constant 0 : index
      %c0_76 = arith.constant 0 : index
      %c0_77 = arith.constant 0 : index
      %131 = vector.load %arg13[%c0_75, %c0_76, %c0_77] : memref<2x32x96xf32, #tpu.memory_space<vmem>>, vector<1x32x96xf32>
      %132 = vector.shape_cast %131 : vector<1x32x96xf32> to vector<32x96xf32>
      %c0_78 = arith.constant 0 : index
      %c0_79 = arith.constant 0 : index
      %c0_80 = arith.constant 0 : index
      %133 = vector.load %arg14[%c0_78, %c0_79, %c0_80] : memref<2x1x96xf32, #tpu.memory_space<vmem>>, vector<1x1x96xf32>
      %134 = vector.shape_cast %133 : vector<1x1x96xf32> to vector<1x96xf32>
      %c0_81 = arith.constant 0 : index
      %c0_82 = arith.constant 0 : index
      %c0_83 = arith.constant 0 : index
      %135 = vector.load %arg15[%c0_81, %c0_82, %c0_83] : memref<2x1x96xf32, #tpu.memory_space<vmem>>, vector<1x1x96xf32>
      %136 = vector.shape_cast %135 : vector<1x1x96xf32> to vector<1x96xf32>
      %cst_84 = arith.constant dense<0.000000e+00> : vector<8x96xf32>
      %137 = tpu.matmul %46, %132, %cst_84 {dimension_numbers = #tpu.dot_dimension_numbers<[1], [0], [0], [1], [0, 0, 1, 1], [], []>} : vector<8x32xf32>, vector<32x96xf32>, vector<8x96xf32> -> vector<8x96xf32>
      %cst_85 = arith.constant dense<0.000000e+00> : vector<8xf32>
      %138 = vector.multi_reduction <add>, %137, %cst_85 [1] : vector<8x96xf32> to vector<8xf32>
      %139 = vector.shape_cast %138 : vector<8xf32> to vector<8x1xf32>
      %cst_86 = arith.constant 9.600000e+01 : f32
      %140 = vector.broadcast %cst_86 : f32 to vector<8x1xf32>
      %141 = arith.divf %139, %140 : vector<8x1xf32>
      %142 = vector.broadcast %141 : vector<8x1xf32> to vector<8x96xf32>
      %143 = arith.subf %137, %142 : vector<8x96xf32>
      %144 = arith.mulf %143, %143 : vector<8x96xf32>
      %cst_87 = arith.constant dense<0.000000e+00> : vector<8xf32>
      %145 = vector.multi_reduction <add>, %144, %cst_87 [1] : vector<8x96xf32> to vector<8xf32>
      %146 = vector.shape_cast %145 : vector<8xf32> to vector<8x1xf32>
      %cst_88 = arith.constant 9.600000e+01 : f32
      %147 = vector.broadcast %cst_88 : f32 to vector<8x1xf32>
      %148 = arith.divf %146, %147 : vector<8x1xf32>
      %149 = vector.broadcast %141 : vector<8x1xf32> to vector<8x96xf32>
      %150 = arith.subf %137, %149 : vector<8x96xf32>
      %cst_89 = arith.constant 9.99999974E-6 : f32
      %151 = vector.broadcast %cst_89 : f32 to vector<8x1xf32>
      %152 = arith.addf %148, %151 : vector<8x1xf32>
      %153 = math.rsqrt %152 : vector<8x1xf32>
      %154 = vector.broadcast %153 : vector<8x1xf32> to vector<8x96xf32>
      %155 = arith.mulf %150, %154 : vector<8x96xf32>
      %156 = vector.broadcast %134 : vector<1x96xf32> to vector<8x96xf32>
      %157 = arith.mulf %155, %156 : vector<8x96xf32>
      %158 = vector.broadcast %136 : vector<1x96xf32> to vector<8x96xf32>
      %159 = arith.addf %157, %158 : vector<8x96xf32>
      %160 = vector.extract_strided_slice %130 {offsets = [0, 0], sizes = [8, 32], strides = [1, 1]} : vector<8x96xf32> to vector<8x32xf32>
      %161 = vector.extract_strided_slice %130 {offsets = [0, 32], sizes = [8, 32], strides = [1, 1]} : vector<8x96xf32> to vector<8x32xf32>
      %162 = vector.extract_strided_slice %130 {offsets = [0, 64], sizes = [8, 32], strides = [1, 1]} : vector<8x96xf32> to vector<8x32xf32>
      %163 = vector.extract_strided_slice %159 {offsets = [0, 0], sizes = [8, 32], strides = [1, 1]} : vector<8x96xf32> to vector<8x32xf32>
      %164 = vector.extract_strided_slice %159 {offsets = [0, 32], sizes = [8, 32], strides = [1, 1]} : vector<8x96xf32> to vector<8x32xf32>
      %165 = vector.extract_strided_slice %159 {offsets = [0, 64], sizes = [8, 32], strides = [1, 1]} : vector<8x96xf32> to vector<8x32xf32>
      %166 = arith.negf %160 : vector<8x32xf32>
      %167 = math.exp %166 : vector<8x32xf32>
      %cst_90 = arith.constant 1.000000e+00 : f32
      %168 = vector.broadcast %cst_90 : f32 to vector<8x32xf32>
      %169 = arith.addf %168, %167 : vector<8x32xf32>
      %170 = arith.divf %168, %169 : vector<8x32xf32>
      %171 = arith.negf %163 : vector<8x32xf32>
      %172 = math.exp %171 : vector<8x32xf32>
      %cst_91 = arith.constant 1.000000e+00 : f32
      %173 = vector.broadcast %cst_91 : f32 to vector<8x32xf32>
      %174 = arith.addf %173, %172 : vector<8x32xf32>
      %175 = arith.divf %173, %174 : vector<8x32xf32>
      %176 = arith.mulf %170, %161 : vector<8x32xf32>
      %cst_92 = arith.constant 1.000000e+00 : f32
      %177 = vector.broadcast %cst_92 : f32 to vector<8x32xf32>
      %178 = arith.subf %177, %170 : vector<8x32xf32>
      %179 = arith.mulf %178, %164 : vector<8x32xf32>
      %180 = arith.addf %176, %179 : vector<8x32xf32>
      %181 = arith.mulf %175, %165 : vector<8x32xf32>
      %cst_93 = arith.constant 1.000000e+00 : f32
      %182 = vector.broadcast %cst_93 : f32 to vector<8x32xf32>
      %183 = arith.subf %182, %175 : vector<8x32xf32>
      %184 = arith.mulf %183, %162 : vector<8x32xf32>
      %185 = arith.addf %181, %184 : vector<8x32xf32>
      %c0_94 = arith.constant 0 : index
      %c0_95 = arith.constant 0 : index
      %c0_96 = arith.constant 0 : index
      %186 = vector.load %arg17[%c0_94, %c0_95, %c0_96] : memref<2x8x32xf32, #tpu.memory_space<vmem>>, vector<1x8x32xf32>
      %187 = vector.shape_cast %186 : vector<1x8x32xf32> to vector<8x32xf32>
      %188 = vector.shape_cast %180 : vector<8x32xf32> to vector<1x8x32xf32>
      tpu.vector_store %arg17[%c0_94, %c0_95, %c0_96], %188 {strides = array<i32>} : memref<2x8x32xf32, #tpu.memory_space<vmem>>, vector<1x8x32xf32>,
      %c0_i32_97 = arith.constant 0 : i32
      %189 = arith.addi %c0_i32_97, %56 : i32
      %190 = arith.index_cast %189 : i32 to index
      %c0_98 = arith.constant 0 : index
      %c0_99 = arith.constant 0 : index
      %191 = vector.load %arg18[%190, %c0_98, %c0_99] : memref<8x8x32xf32, #tpu.memory_space<vmem>>, vector<1x8x32xf32>
      %192 = vector.shape_cast %191 : vector<1x8x32xf32> to vector<8x32xf32>
      %193 = vector.shape_cast %180 : vector<8x32xf32> to vector<1x8x32xf32>
      tpu.vector_store %arg18[%190, %c0_98, %c0_99], %193 {strides = array<i32>} : memref<8x8x32xf32, #tpu.memory_space<vmem>>, vector<1x8x32xf32>,
      %c1 = arith.constant 1 : index
      %c0_100 = arith.constant 0 : index
      %c0_101 = arith.constant 0 : index
      %194 = vector.load %arg17[%c1, %c0_100, %c0_101] : memref<2x8x32xf32, #tpu.memory_space<vmem>>, vector<1x8x32xf32>
      %195 = vector.shape_cast %194 : vector<1x8x32xf32> to vector<8x32xf32>
      %c4 = arith.constant 4 : index
      %c0_102 = arith.constant 0 : index
      %c0_103 = arith.constant 0 : index
      %196 = vector.load %arg18[%c4, %c0_102, %c0_103] : memref<8x8x32xf32, #tpu.memory_space<vmem>>, vector<4x8x32xf32>
      %cst_104 = arith.constant dense<0.000000e+00> : vector<8x32xf32>
      %197 = vector.multi_reduction <add>, %196, %cst_104 [0] : vector<4x8x32xf32> to vector<8x32xf32>
      %cst_105 = arith.constant 2.500000e-01 : f32
      %198 = vector.broadcast %cst_105 : f32 to vector<8x32xf32>
      %199 = arith.mulf %197, %198 : vector<8x32xf32>
      %c1_106 = arith.constant 1 : index
      %c0_107 = arith.constant 0 : index
      %c0_108 = arith.constant 0 : index
      %200 = vector.load %arg10[%c1_106, %c0_107, %c0_108] : memref<2x32x32xf32, #tpu.memory_space<vmem>>, vector<1x32x32xf32>
      %201 = vector.shape_cast %200 : vector<1x32x32xf32> to vector<32x32xf32>
      %c1_109 = arith.constant 1 : index
      %c0_110 = arith.constant 0 : index
      %c0_111 = arith.constant 0 : index
      %202 = vector.load %arg11[%c1_109, %c0_110, %c0_111] : memref<2x1x32xf32, #tpu.memory_space<vmem>>, vector<1x1x32xf32>
      %203 = vector.shape_cast %202 : vector<1x1x32xf32> to vector<1x32xf32>
      %c1_112 = arith.constant 1 : index
      %c0_113 = arith.constant 0 : index
      %c0_114 = arith.constant 0 : index
      %204 = vector.load %arg12[%c1_112, %c0_113, %c0_114] : memref<2x1x32xf32, #tpu.memory_space<vmem>>, vector<1x1x32xf32>
      %205 = vector.shape_cast %204 : vector<1x1x32xf32> to vector<1x32xf32>
      %cst_115 = arith.constant dense<0.000000e+00> : vector<8x32xf32>
      %206 = tpu.matmul %195, %201, %cst_115 {dimension_numbers = #tpu.dot_dimension_numbers<[1], [0], [0], [1], [0, 0, 1, 1], [], []>} : vector<8x32xf32>, vector<32x32xf32>, vector<8x32xf32> -> vector<8x32xf32>
      %cst_116 = arith.constant dense<0.000000e+00> : vector<8xf32>
      %207 = vector.multi_reduction <add>, %206, %cst_116 [1] : vector<8x32xf32> to vector<8xf32>
      %208 = vector.shape_cast %207 : vector<8xf32> to vector<8x1xf32>
      %cst_117 = arith.constant 3.200000e+01 : f32
      %209 = vector.broadcast %cst_117 : f32 to vector<8x1xf32>
      %210 = arith.divf %208, %209 : vector<8x1xf32>
      %211 = vector.broadcast %210 : vector<8x1xf32> to vector<8x32xf32>
      %212 = arith.subf %206, %211 : vector<8x32xf32>
      %213 = arith.mulf %212, %212 : vector<8x32xf32>
      %cst_118 = arith.constant dense<0.000000e+00> : vector<8xf32>
      %214 = vector.multi_reduction <add>, %213, %cst_118 [1] : vector<8x32xf32> to vector<8xf32>
      %215 = vector.shape_cast %214 : vector<8xf32> to vector<8x1xf32>
      %cst_119 = arith.constant 3.200000e+01 : f32
      %216 = vector.broadcast %cst_119 : f32 to vector<8x1xf32>
      %217 = arith.divf %215, %216 : vector<8x1xf32>
      %218 = vector.broadcast %210 : vector<8x1xf32> to vector<8x32xf32>
      %219 = arith.subf %206, %218 : vector<8x32xf32>
      %cst_120 = arith.constant 9.99999974E-6 : f32
      %220 = vector.broadcast %cst_120 : f32 to vector<8x1xf32>
      %221 = arith.addf %217, %220 : vector<8x1xf32>
      %222 = math.rsqrt %221 : vector<8x1xf32>
      %223 = vector.broadcast %222 : vector<8x1xf32> to vector<8x32xf32>
      %224 = arith.mulf %219, %223 : vector<8x32xf32>
      %225 = vector.broadcast %203 : vector<1x32xf32> to vector<8x32xf32>
      %226 = arith.mulf %224, %225 : vector<8x32xf32>
      %227 = vector.broadcast %205 : vector<1x32xf32> to vector<8x32xf32>
      %228 = arith.addf %226, %227 : vector<8x32xf32>
      %229 = arith.negf %228 : vector<8x32xf32>
      %230 = math.exp %229 : vector<8x32xf32>
      %cst_121 = arith.constant 1.000000e+00 : f32
      %231 = vector.broadcast %cst_121 : f32 to vector<8x32xf32>
      %232 = arith.addf %231, %230 : vector<8x32xf32>
      %233 = arith.divf %231, %232 : vector<8x32xf32>
      %234 = arith.mulf %233, %195 : vector<8x32xf32>
      %cst_122 = arith.constant 1.000000e+00 : f32
      %235 = vector.broadcast %cst_122 : f32 to vector<8x32xf32>
      %236 = arith.subf %235, %233 : vector<8x32xf32>
      %237 = arith.mulf %236, %199 : vector<8x32xf32>
      %238 = arith.addf %234, %237 : vector<8x32xf32>
      %c1_123 = arith.constant 1 : index
      %c0_124 = arith.constant 0 : index
      %c0_125 = arith.constant 0 : index
      %239 = vector.load %arg7[%c1_123, %c0_124, %c0_125] : memref<2x32x96xf32, #tpu.memory_space<vmem>>, vector<1x32x96xf32>
      %240 = vector.shape_cast %239 : vector<1x32x96xf32> to vector<32x96xf32>
      %c1_126 = arith.constant 1 : index
      %c0_127 = arith.constant 0 : index
      %c0_128 = arith.constant 0 : index
      %241 = vector.load %arg8[%c1_126, %c0_127, %c0_128] : memref<2x1x96xf32, #tpu.memory_space<vmem>>, vector<1x1x96xf32>
      %242 = vector.shape_cast %241 : vector<1x1x96xf32> to vector<1x96xf32>
      %c1_129 = arith.constant 1 : index
      %c0_130 = arith.constant 0 : index
      %c0_131 = arith.constant 0 : index
      %243 = vector.load %arg9[%c1_129, %c0_130, %c0_131] : memref<2x1x96xf32, #tpu.memory_space<vmem>>, vector<1x1x96xf32>
      %244 = vector.shape_cast %243 : vector<1x1x96xf32> to vector<1x96xf32>
      %cst_132 = arith.constant dense<0.000000e+00> : vector<8x96xf32>
      %245 = tpu.matmul %238, %240, %cst_132 {dimension_numbers = #tpu.dot_dimension_numbers<[1], [0], [0], [1], [0, 0, 1, 1], [], []>} : vector<8x32xf32>, vector<32x96xf32>, vector<8x96xf32> -> vector<8x96xf32>
      %cst_133 = arith.constant dense<0.000000e+00> : vector<8xf32>
      %246 = vector.multi_reduction <add>, %245, %cst_133 [1] : vector<8x96xf32> to vector<8xf32>
      %247 = vector.shape_cast %246 : vector<8xf32> to vector<8x1xf32>
      %cst_134 = arith.constant 9.600000e+01 : f32
      %248 = vector.broadcast %cst_134 : f32 to vector<8x1xf32>
      %249 = arith.divf %247, %248 : vector<8x1xf32>
      %250 = vector.broadcast %249 : vector<8x1xf32> to vector<8x96xf32>
      %251 = arith.subf %245, %250 : vector<8x96xf32>
      %252 = arith.mulf %251, %251 : vector<8x96xf32>
      %cst_135 = arith.constant dense<0.000000e+00> : vector<8xf32>
      %253 = vector.multi_reduction <add>, %252, %cst_135 [1] : vector<8x96xf32> to vector<8xf32>
      %254 = vector.shape_cast %253 : vector<8xf32> to vector<8x1xf32>
      %cst_136 = arith.constant 9.600000e+01 : f32
      %255 = vector.broadcast %cst_136 : f32 to vector<8x1xf32>
      %256 = arith.divf %254, %255 : vector<8x1xf32>
      %257 = vector.broadcast %249 : vector<8x1xf32> to vector<8x96xf32>
      %258 = arith.subf %245, %257 : vector<8x96xf32>
      %cst_137 = arith.constant 9.99999974E-6 : f32
      %259 = vector.broadcast %cst_137 : f32 to vector<8x1xf32>
      %260 = arith.addf %256, %259 : vector<8x1xf32>
      %261 = math.rsqrt %260 : vector<8x1xf32>
      %262 = vector.broadcast %261 : vector<8x1xf32> to vector<8x96xf32>
      %263 = arith.mulf %258, %262 : vector<8x96xf32>
      %264 = vector.broadcast %242 : vector<1x96xf32> to vector<8x96xf32>
      %265 = arith.mulf %263, %264 : vector<8x96xf32>
      %266 = vector.broadcast %244 : vector<1x96xf32> to vector<8x96xf32>
      %267 = arith.addf %265, %266 : vector<8x96xf32>
      %c1_138 = arith.constant 1 : index
      %c0_139 = arith.constant 0 : index
      %c0_140 = arith.constant 0 : index
      %268 = vector.load %arg13[%c1_138, %c0_139, %c0_140] : memref<2x32x96xf32, #tpu.memory_space<vmem>>, vector<1x32x96xf32>
      %269 = vector.shape_cast %268 : vector<1x32x96xf32> to vector<32x96xf32>
      %c1_141 = arith.constant 1 : index
      %c0_142 = arith.constant 0 : index
      %c0_143 = arith.constant 0 : index
      %270 = vector.load %arg14[%c1_141, %c0_142, %c0_143] : memref<2x1x96xf32, #tpu.memory_space<vmem>>, vector<1x1x96xf32>
      %271 = vector.shape_cast %270 : vector<1x1x96xf32> to vector<1x96xf32>
      %c1_144 = arith.constant 1 : index
      %c0_145 = arith.constant 0 : index
      %c0_146 = arith.constant 0 : index
      %272 = vector.load %arg15[%c1_144, %c0_145, %c0_146] : memref<2x1x96xf32, #tpu.memory_space<vmem>>, vector<1x1x96xf32>
      %273 = vector.shape_cast %272 : vector<1x1x96xf32> to vector<1x96xf32>
      %cst_147 = arith.constant dense<0.000000e+00> : vector<8x96xf32>
      %274 = tpu.matmul %185, %269, %cst_147 {dimension_numbers = #tpu.dot_dimension_numbers<[1], [0], [0], [1], [0, 0, 1, 1], [], []>} : vector<8x32xf32>, vector<32x96xf32>, vector<8x96xf32> -> vector<8x96xf32>
      %cst_148 = arith.constant dense<0.000000e+00> : vector<8xf32>
      %275 = vector.multi_reduction <add>, %274, %cst_148 [1] : vector<8x96xf32> to vector<8xf32>
      %276 = vector.shape_cast %275 : vector<8xf32> to vector<8x1xf32>
      %cst_149 = arith.constant 9.600000e+01 : f32
      %277 = vector.broadcast %cst_149 : f32 to vector<8x1xf32>
      %278 = arith.divf %276, %277 : vector<8x1xf32>
      %279 = vector.broadcast %278 : vector<8x1xf32> to vector<8x96xf32>
      %280 = arith.subf %274, %279 : vector<8x96xf32>
      %281 = arith.mulf %280, %280 : vector<8x96xf32>
      %cst_150 = arith.constant dense<0.000000e+00> : vector<8xf32>
      %282 = vector.multi_reduction <add>, %281, %cst_150 [1] : vector<8x96xf32> to vector<8xf32>
      %283 = vector.shape_cast %282 : vector<8xf32> to vector<8x1xf32>
      %cst_151 = arith.constant 9.600000e+01 : f32
      %284 = vector.broadcast %cst_151 : f32 to vector<8x1xf32>
      %285 = arith.divf %283, %284 : vector<8x1xf32>
      %286 = vector.broadcast %278 : vector<8x1xf32> to vector<8x96xf32>
      %287 = arith.subf %274, %286 : vector<8x96xf32>
      %cst_152 = arith.constant 9.99999974E-6 : f32
      %288 = vector.broadcast %cst_152 : f32 to vector<8x1xf32>
      %289 = arith.addf %285, %288 : vector<8x1xf32>
      %290 = math.rsqrt %289 : vector<8x1xf32>
      %291 = vector.broadcast %290 : vector<8x1xf32> to vector<8x96xf32>
      %292 = arith.mulf %287, %291 : vector<8x96xf32>
      %293 = vector.broadcast %271 : vector<1x96xf32> to vector<8x96xf32>
      %294 = arith.mulf %292, %293 : vector<8x96xf32>
      %295 = vector.broadcast %273 : vector<1x96xf32> to vector<8x96xf32>
      %296 = arith.addf %294, %295 : vector<8x96xf32>
      %297 = vector.extract_strided_slice %267 {offsets = [0, 0], sizes = [8, 32], strides = [1, 1]} : vector<8x96xf32> to vector<8x32xf32>
      %298 = vector.extract_strided_slice %267 {offsets = [0, 32], sizes = [8, 32], strides = [1, 1]} : vector<8x96xf32> to vector<8x32xf32>
      %299 = vector.extract_strided_slice %267 {offsets = [0, 64], sizes = [8, 32], strides = [1, 1]} : vector<8x96xf32> to vector<8x32xf32>
      %300 = vector.extract_strided_slice %296 {offsets = [0, 0], sizes = [8, 32], strides = [1, 1]} : vector<8x96xf32> to vector<8x32xf32>
      %301 = vector.extract_strided_slice %296 {offsets = [0, 32], sizes = [8, 32], strides = [1, 1]} : vector<8x96xf32> to vector<8x32xf32>
      %302 = vector.extract_strided_slice %296 {offsets = [0, 64], sizes = [8, 32], strides = [1, 1]} : vector<8x96xf32> to vector<8x32xf32>
      %303 = arith.negf %297 : vector<8x32xf32>
      %304 = math.exp %303 : vector<8x32xf32>
      %cst_153 = arith.constant 1.000000e+00 : f32
      %305 = vector.broadcast %cst_153 : f32 to vector<8x32xf32>
      %306 = arith.addf %305, %304 : vector<8x32xf32>
      %307 = arith.divf %305, %306 : vector<8x32xf32>
      %308 = arith.negf %300 : vector<8x32xf32>
      %309 = math.exp %308 : vector<8x32xf32>
      %cst_154 = arith.constant 1.000000e+00 : f32
      %310 = vector.broadcast %cst_154 : f32 to vector<8x32xf32>
      %311 = arith.addf %310, %309 : vector<8x32xf32>
      %312 = arith.divf %310, %311 : vector<8x32xf32>
      %313 = arith.mulf %307, %298 : vector<8x32xf32>
      %cst_155 = arith.constant 1.000000e+00 : f32
      %314 = vector.broadcast %cst_155 : f32 to vector<8x32xf32>
      %315 = arith.subf %314, %307 : vector<8x32xf32>
      %316 = arith.mulf %315, %301 : vector<8x32xf32>
      %317 = arith.addf %313, %316 : vector<8x32xf32>
      %318 = arith.mulf %312, %302 : vector<8x32xf32>
      %cst_156 = arith.constant 1.000000e+00 : f32
      %319 = vector.broadcast %cst_156 : f32 to vector<8x32xf32>
      %320 = arith.subf %319, %312 : vector<8x32xf32>
      %321 = arith.mulf %320, %299 : vector<8x32xf32>
      %322 = arith.addf %318, %321 : vector<8x32xf32>
      %c1_157 = arith.constant 1 : index
      %c0_158 = arith.constant 0 : index
      %c0_159 = arith.constant 0 : index
      %323 = vector.load %arg17[%c1_157, %c0_158, %c0_159] : memref<2x8x32xf32, #tpu.memory_space<vmem>>, vector<1x8x32xf32>
      %324 = vector.shape_cast %323 : vector<1x8x32xf32> to vector<8x32xf32>
      %325 = vector.shape_cast %317 : vector<8x32xf32> to vector<1x8x32xf32>
      tpu.vector_store %arg17[%c1_157, %c0_158, %c0_159], %325 {strides = array<i32>} : memref<2x8x32xf32, #tpu.memory_space<vmem>>, vector<1x8x32xf32>,
      %c4_i32_160 = arith.constant 4 : i32
      %326 = arith.addi %c4_i32_160, %56 : i32
      %327 = arith.index_cast %326 : i32 to index
      %c0_161 = arith.constant 0 : index
      %c0_162 = arith.constant 0 : index
      %328 = vector.load %arg18[%327, %c0_161, %c0_162] : memref<8x8x32xf32, #tpu.memory_space<vmem>>, vector<1x8x32xf32>
      %329 = vector.shape_cast %328 : vector<1x8x32xf32> to vector<8x32xf32>
      %330 = vector.shape_cast %317 : vector<8x32xf32> to vector<1x8x32xf32>
      tpu.vector_store %arg18[%327, %c0_161, %c0_162], %330 {strides = array<i32>} : memref<8x8x32xf32, #tpu.memory_space<vmem>>, vector<1x8x32xf32>,
      %331 = arith.addf %322, %46 : vector<8x32xf32>
      %c0_163 = arith.constant 0 : index
      %c0_164 = arith.constant 0 : index
      %332 = vector.load %arg6[%c0_163, %c0_164] : memref<32x16xf32, #tpu.memory_space<vmem>>, vector<32x16xf32>
      %cst_165 = arith.constant dense<0.000000e+00> : vector<8x16xf32>
      %333 = tpu.matmul %331, %332, %cst_165 {dimension_numbers = #tpu.dot_dimension_numbers<[1], [0], [0], [1], [0, 0, 1, 1], [], []>} : vector<8x32xf32>, vector<32x16xf32>, vector<8x16xf32> -> vector<8x16xf32>
      %334 = arith.index_cast %arg19 : i32 to index
      %c0_166 = arith.constant 0 : index
      %c0_167 = arith.constant 0 : index
      %335 = vector.load %arg16[%334, %c0_166, %c0_167] : memref<7x8x16xf32, #tpu.memory_space<vmem>>, vector<1x8x16xf32>
      %336 = vector.shape_cast %335 : vector<1x8x16xf32> to vector<8x16xf32>
      %337 = vector.shape_cast %333 : vector<8x16xf32> to vector<1x8x16xf32>
      tpu.vector_store %arg16[%334, %c0_166, %c0_167], %337 {strides = array<i32>} : memref<7x8x16xf32, #tpu.memory_space<vmem>>, vector<1x8x16xf32>,
      scf.yield %333 : vector<8x16xf32>
    }
    %c3_i32_10 = arith.constant 3 : i32
    return
  }
  func.func @transform_0(%arg0: i32) -> (i32, i32, i32) {
    %c0_i32 = arith.constant 0 : i32
    %c0_i32_0 = arith.constant 0 : i32
    %c0_i32_1 = arith.constant 0 : i32
    return %c0_i32, %arg0, %c0_i32_0 : i32, i32, i32
  }
  func.func @transform_1(%arg0: i32) -> (i32, i32, i32) {
    %c0_i32 = arith.constant 0 : i32
    %c0_i32_0 = arith.constant 0 : i32
    %c0_i32_1 = arith.constant 0 : i32
    return %c0_i32, %arg0, %c0_i32_0 : i32, i32, i32
  }
  func.func @transform_2(%arg0: i32) -> (i32, i32) {
    %c0_i32 = arith.constant 0 : i32
    %c0_i32_0 = arith.constant 0 : i32
    %c0_i32_1 = arith.constant 0 : i32
    return %c0_i32, %c0_i32_0 : i32, i32
  }
  func.func @transform_3(%arg0: i32) -> (i32, i32) {
    %c0_i32 = arith.constant 0 : i32
    %c0_i32_0 = arith.constant 0 : i32
    %c0_i32_1 = arith.constant 0 : i32
    return %c0_i32, %c0_i32_0 : i32, i32
  }
  func.func @transform_4(%arg0: i32) -> (i32, i32) {
    %c0_i32 = arith.constant 0 : i32
    %c0_i32_0 = arith.constant 0 : i32
    %c0_i32_1 = arith.constant 0 : i32
    return %c0_i32, %c0_i32_0 : i32, i32
  }
  func.func @transform_5(%arg0: i32) -> (i32, i32) {
    %c0_i32 = arith.constant 0 : i32
    %c0_i32_0 = arith.constant 0 : i32
    %c0_i32_1 = arith.constant 0 : i32
    return %c0_i32, %c0_i32_0 : i32, i32
  }
  func.func @transform_6(%arg0: i32) -> (i32, i32, i32) {
    %c0_i32 = arith.constant 0 : i32
    %c0_i32_0 = arith.constant 0 : i32
    %c0_i32_1 = arith.constant 0 : i32
    %c0_i32_2 = arith.constant 0 : i32
    return %c0_i32, %c0_i32_0, %c0_i32_1 : i32, i32, i32
  }
  func.func @transform_7(%arg0: i32) -> (i32, i32, i32) {
    %c0_i32 = arith.constant 0 : i32
    %c0_i32_0 = arith.constant 0 : i32
    %c0_i32_1 = arith.constant 0 : i32
    %c0_i32_2 = arith.constant 0 : i32
    return %c0_i32, %c0_i32_0, %c0_i32_1 : i32, i32, i32
  }
  func.func @transform_8(%arg0: i32) -> (i32, i32, i32) {
    %c0_i32 = arith.constant 0 : i32
    %c0_i32_0 = arith.constant 0 : i32
    %c0_i32_1 = arith.constant 0 : i32
    %c0_i32_2 = arith.constant 0 : i32
    return %c0_i32, %c0_i32_0, %c0_i32_1 : i32, i32, i32
  }
  func.func @transform_9(%arg0: i32) -> (i32, i32, i32) {
    %c0_i32 = arith.constant 0 : i32
    %c0_i32_0 = arith.constant 0 : i32
    %c0_i32_1 = arith.constant 0 : i32
    %c0_i32_2 = arith.constant 0 : i32
    return %c0_i32, %c0_i32_0, %c0_i32_1 : i32, i32, i32
  }
  func.func @transform_10(%arg0: i32) -> (i32, i32, i32) {
    %c0_i32 = arith.constant 0 : i32
    %c0_i32_0 = arith.constant 0 : i32
    %c0_i32_1 = arith.constant 0 : i32
    %c0_i32_2 = arith.constant 0 : i32
    return %c0_i32, %c0_i32_0, %c0_i32_1 : i32, i32, i32
  }
  func.func @transform_11(%arg0: i32) -> (i32, i32, i32) {
    %c0_i32 = arith.constant 0 : i32
    %c0_i32_0 = arith.constant 0 : i32
    %c0_i32_1 = arith.constant 0 : i32
    %c0_i32_2 = arith.constant 0 : i32
    return %c0_i32, %c0_i32_0, %c0_i32_1 : i32, i32, i32
  }
  func.func @transform_12(%arg0: i32) -> (i32, i32, i32) {
    %c0_i32 = arith.constant 0 : i32
    %c0_i32_0 = arith.constant 0 : i32
    %c0_i32_1 = arith.constant 0 : i32
    %c0_i32_2 = arith.constant 0 : i32
    return %c0_i32, %c0_i32_0, %c0_i32_1 : i32, i32, i32
  }
  func.func @transform_13(%arg0: i32) -> (i32, i32, i32) {
    %c0_i32 = arith.constant 0 : i32
    %c0_i32_0 = arith.constant 0 : i32
    %c0_i32_1 = arith.constant 0 : i32
    %c0_i32_2 = arith.constant 0 : i32
    return %c0_i32, %c0_i32_0, %c0_i32_1 : i32, i32, i32
  }
  func.func @transform_14(%arg0: i32) -> (i32, i32, i32) {
    %c0_i32 = arith.constant 0 : i32
    %c0_i32_0 = arith.constant 0 : i32
    %c0_i32_1 = arith.constant 0 : i32
    %c0_i32_2 = arith.constant 0 : i32
    return %c0_i32, %c0_i32_0, %c0_i32_1 : i32, i32, i32
  }
  func.func @transform_15(%arg0: i32) -> (i32, i32, i32) {
    %c0_i32 = arith.constant 0 : i32
    %c0_i32_0 = arith.constant 0 : i32
    %c0_i32_1 = arith.constant 0 : i32
    return %c0_i32, %arg0, %c0_i32_0 : i32, i32, i32
  }
}

</mosaic_0001>

<bundles_post_ra>
// kernel: rnn_forward.1
= control target key start
LH: loop header
LB: loop body
LE: loop exit
PB: predicated region body
PF: predicated region fallthrough
CT: control target
= control target key end

     0   :  { %20 = vsyncpa [#allocation5], 0  ;;  %s1772_s21 = smov [#allocation4]   ;;  %s1773_s23 = smov 128   ;;  %s2352_s0 = inlined_call_operand.vmem [shape: f32[8,8,16], index: 0, kind: input, shape index: {}]   ;;  %s2353_s1 = inlined_call_operand.vmem [shape: f32[3,8,16], index: 1, kind: input, shape index: {}]   ;;  %s2354_s2 = inlined_call_operand.vmem [shape: f32[16,32], index: 2, kind: input, shape index: {}]   ;;  %s2355_s3 = inlined_call_operand.vmem [shape: f32[1,32], index: 3, kind: input, shape index: {}]   ;;  %s2356_s4 = inlined_call_operand.vmem [shape: f32[1,32], index: 4, kind: input, shape index: {}]   ;;  %s2357_s5 = inlined_call_operand.vmem [shape: f32[32,16], index: 5, kind: input, shape index: {}]   ;;  %s2358_s6 = inlined_call_operand.vmem [shape: f32[2,32,96], index: 6, kind: input, shape index: {}]   ;;  %s2359_s7 = inlined_call_operand.vmem [shape: f32[2,1,96], index: 7, kind: input, shape index: {}]   ;;  %s2360_s8 = inlined_call_operand.vmem [shape: f32[2,1,96], index: 8, kind: input, shape index: {}]   ;;  %s2361_s9 = inlined_call_operand.vmem [shape: f32[2,32,32], index: 9, kind: input, shape index: {}]   ;;  %s2362_s10 = inlined_call_operand.vmem [shape: f32[2,1,32], index: 10, kind: input, shape index: {}]   ;;  %s2363_s11 = inlined_call_operand.vmem [shape: f32[2,1,32], index: 11, kind: input, shape index: {}]   ;;  %s2364_s12 = inlined_call_operand.hbm [shape: f32[2,32,96], index: 12, kind: input, shape index: {}]   ;;  %s2365_s13 = inlined_call_operand.vmem [shape: f32[2,1,96], index: 13, kind: input, shape index: {}]   ;;  %s2366_s14 = inlined_call_operand.vmem [shape: f32[2,1,96], index: 14, kind: input, shape index: {}]   ;;  %s2367_s15 = inlined_call_operand.vmem [shape: f32[7,8,16], index: 15, kind: output, shape index: {}]  }
   0x1   :  { %s49_s20 = sshll.u32 %s2364_s12, 4  ;;  %s51_s22 = sshll.u32 %s1772_s21, 4  ;;  %s50_s20 = int_to_ptr.hbm [resolvable:$true] %s49_s20  ;;  %s52_s22 = int_to_ptr.vmem [resolvable:$true] %s51_s22 }
   0x2   :  { %s1774_s24 = smov 8  }
   0x3   :  { %57 = dma.hbm_to_vmem [thread:$0]  %s50_s20, 1024, %s52_s22, [#allocation5], %s1773_s23, %s1773_s23, %s1774_s24  }
   0x4   :  { %1758 = dma.done.wait [#allocation5], 1024  }
   0x5   :  { %1759 = vsyncadd [#allocation5], 4294966272  ;;  %vm66_vm0 = vcmask 261120   ;;  %v1775_v0 = vmov 0.0   ;;  %s1875_s12 = smov 0  }
   0x6   :  { %67 = vst.msk [vmem:[#allocation2] sm:$0xff] %vm66_vm0, %v1775_v0 }
   0x7   :  { %68 = vst.msk [vmem:[#allocation2 + $0x8] sm:$0xff] %vm66_vm0, %v1775_v0 }
   0x8   :  { %69 = vst.msk [vmem:[#allocation3] sm:$0xff] %vm66_vm0, %v1775_v0 }
   0x9   :  { %70 = vst.msk [vmem:[#allocation3 + $0x8] sm:$0xff] %vm66_vm0, %v1775_v0 }
   0xa   :  { %71 = vst.msk [vmem:[#allocation3 + $0x10] sm:$0xff] %vm66_vm0, %v1775_v0 }
   0xb   :  { %72 = vst.msk [vmem:[#allocation3 + $0x18] sm:$0xff] %vm66_vm0, %v1775_v0 }
   0xc   :  { %73 = vst.msk [vmem:[#allocation3 + $0x20] sm:$0xff] %vm66_vm0, %v1775_v0 }
   0xd   :  { %74 = vst.msk [vmem:[#allocation3 + $0x28] sm:$0xff] %vm66_vm0, %v1775_v0 }
   0xe   :  { %75 = vst.msk [vmem:[#allocation3 + $0x30] sm:$0xff] %vm66_vm0, %v1775_v0 }
   0xf   :  { %76 = vst.msk [vmem:[#allocation3 + $0x38] sm:$0xff] %vm66_vm0, %v1775_v0 }
  0x10 LB: > { %v180_v1 = vld [vmem:[%s2361_s9 + $0x18] sm:$0xff]  ;;  %v179_v2 = vld [vmem:[%s2361_s9 + $0x10] sm:$0xff]  ;;  %v88_v3 = vld [vmem:[%s2354_s2 + $0x8] sm:$0xff]  ;;  %s1508_s20 = sshll.u32 %s1762_s12, 3  ;;  %vm91_vm1 = vcmask 130048   ;;  %v1776_v13 = vmov 32.0   ;;  %s1762_s12 = sphi %s1875_s12, %s82_s12  }
  0x11   : > { %198 = vmatpush.msra.mxu1 %v180_v1  ;;  %v178_v4 = vld [vmem:[%s2361_s9 + $0x8] sm:$0xff]  ;;  %109 = vmatpush.msra.mxu0 %v88_v3  ;;  %v87_v5 = vld [vmem:[%s2354_s2] sm:$0xff]  ;;  %s85_s25 = scalar_lea.vmem %s2352_s0, %s1508_s20  ;;  %1628 = vrcp.f32 %v1776_v13  ;;  %v1523_v16 = vld [vmem:[%s2361_s9 + $0x38] sm:$0xff]  ;;  %vm288_vm13 = vcmask 785408   ;;  %s1778_s26 = smov 96  }
  0x12   : > { %v177_v6 = vld [vmem:[%s2361_s9] sm:$0xff]  ;;  %v1522_v17 = vld [vmem:[%s2361_s9 + $0x30] sm:$0xff]  ;;  %v1521_v19 = vld [vmem:[%s2361_s9 + $0x28] sm:$0xff]  ;;  %s1779_s16 = smov 64   ;;  %s153_s22 = ssub.s32 0, %s1762_s12 }
  0x13   : > { %199 = vmatpush.msra.mxu1 %v179_v2  ;;  %110 = vmatpush.msra.mxu0 %v87_v5  ;;  %v86_v7 = vld [vmem:[%s85_s25] sm:$0xff]  ;;  %v1923_v21 = vld [vmem:[#allocation2 + $0x8] sm:$0xff]  ;;  %v327_v39 = vld [vmem:[#allocation4 + $0x8] sm:$0xff]  ;;  %s1510_s23 = smin.u32 %s1762_s12, %s153_s22  ;;  %p152_p0 = scmp.lt.s32.totalorder %s1762_s12, 0 }
  0x14   : > { %v1904_v8 = vld [vmem:[#allocation2] sm:$0xff]  ;;  %1509 = vmatmul.msk.f32.vlgmr.msra.gmra.mxu0 %vm91_vm1, %v86_v7  ;;  %v329_v35 = vld [vmem:[#allocation4 + $0x18] sm:$0xff]  ;;  %v326_v41 = vld [vmem:[#allocation4] sm:$0xff]  ;;  %s155_s29 = sand.u32 3, %s1510_s23   ;;  %s766_s17 = scalar_lea.vmem %s2367_s15, %s1508_s20 }
  0x15   : > { %200 = vmatpush.msra.mxu1 %v178_v4  ;;  %488 = vmatpush.msrb.mxu0 %v1523_v16  ;;  %v1520_v20 = vld [vmem:[%s2361_s9 + $0x20] sm:$0xff]  ;;  %v262_v44 = vld [vmem:[%s2358_s6 + $0x18] sm:$0xff]  ;;  %v261_v45 = vld [vmem:[%s2358_s6 + $0x10] sm:$0xff]  ;;  %s156_s18 = ssub.s32 0, %s155_s29  ;;  %s82_s12 = sadd.s32 1, %s1762_s12  }
  0x16   : > { %347 = vmatpush.msra.mxu3 %v329_v35  ;;  %v328_v36 = vld [vmem:[#allocation4 + $0x10] sm:$0xff]  ;;  %280 = vmatpush.msra.mxu2 %v262_v44  ;;  %v260_v48 = vld [vmem:[%s2358_s6 + $0x8] sm:$0xff]  ;;  %s2373_s18 = smov (!%p152_p0, %s156_s18), %s155_s29  ;;  %p79_p2 = scmp.ge.s32.totalorder %s82_s12, 4  }
  0x17   : > { %201 = vmatpush.msra.mxu1 %v177_v6  ;;  %v1629_v14 = vpop.eup %1628  ;;  %489 = vmatpush.msrb.mxu0 %v1522_v17  ;;  %v259_v52 = vld [vmem:[%s2358_s6] sm:$0xff]  ;;  %p1512_p1 = scmp.lt.s32.totalorder %s2373_s18, 0  ;;  %s162_s22 = sadd.s32 4, %s2373_s18 }
  0x18   : > { %1513 = vmatmul.msk.f32.vlgmr.msra.gmra.mxu1 %vm66_vm0, %v1904_v8  ;;  %v119_v15 = vmul.f32 32.0, %v1629_v14  ;;  %vm123_vm2 = vweird.f32 %v1629_v14  ;;  %348 = vmatpush.msra.mxu3 %v328_v36  ;;  %v1614_v59 = vld [vmem:[%s2362_s10] ss:$0 sm:$0xff] }
  0x19   : > { %490 = vmatpush.msrb.mxu0 %v1521_v19  ;;  %281 = vmatpush.msra.mxu2 %v261_v45  ;;  %v1615_v62 = vld [vmem:[%s2363_s11] ss:$0 sm:$0xff]  ;;  %s2375_s22 = smov (!%p1512_p1, %s162_s22), %s2373_s18  ;;  %s2113_s18 = smov (%p79_p2), 4  }
  0x1a   : > { %v120_v18 = vsub.f32 1.0, %v119_v15  ;;  %349 = vmatpush.msra.mxu3 %v327_v39  ;;  %v1616_v6 = vld [vmem:[%s2355_s3] ss:$0 sm:$0xff]  ;;  %v166_v15 = vld [vmem:[#allocation3 + $0x8] sm:$0xff]  ;;  %s1519_s23 = sshll.u32 %s2375_s22, 3 }
  0x1b   : > { %491 = vmatpush.msrb.mxu0 %v1520_v20  ;;  %282 = vmatpush.msra.mxu2 %v260_v48  ;;  %v167_v19 = vld [vmem:[#allocation3 + $0x10] sm:$0xff]  ;;  %s2041_s24 = scalar_lea.vmem [#allocation3], %s1519_s23 }
  0x1c   : > { %v121_v22 = vmul.f32 %v1629_v14, %v120_v18  ;;  %1526 = vmatmul.msk.f32.vlgmr.msrb.gmra.mxu0 %vm66_vm0, %v1923_v21  ;;  %350 = vmatpush.msra.mxu3 %v326_v41  ;;  %v170_v18 = vsel %vm66_vm0, %v166_v15, 0.0 }
  0x1d   : > { %283 = vmatpush.msra.mxu2 %v259_v52  ;;  %v1777_v52 = vmov 96.0  }
  0x1e   : > { %v122_v23 = vadd.f32 %v1629_v14, %v121_v22  ;;  %v172_v22 = vsel %vm66_vm0, %v167_v19, 0.0 }
  0x20   : > { %v1927_v24 = vsel %vm123_vm2, %v1629_v14, %v122_v23  ;;  %v165_v14 = vld [vmem:[#allocation3] sm:$0xff]  ;;  %v168_v23 = vld [vmem:[#allocation3 + $0x18] sm:$0xff] }
  0x21   : > { %v169_v17 = vsel %vm66_vm0, %v165_v14, 0.0 }
  0x22   : > { %v171_v20 = vadd.f32 %v170_v18, %v169_v17 }
  0x91   : > { %v112_v11 = vpop.f32.mrf.mxu0 }
  0x92   : > { %v115_v12 = vsel %vm66_vm0, %v112_v11, 0.0 }
  0x95   : > { %v203_v9 = vpop.f32.mrf.mxu1 }
  0x96   : > { %v206_v10 = vsel %vm66_vm0, %v203_v9, 0.0 }
  0x97   : > { %207 = vadd.xlane.f32.xlu0 %v206_v10  ;;  %v1617_v10 = vld [vmem:[%s2356_s4] ss:$0 sm:$0xff] }
  0x99   : > { %v1934_v43 = vpop.f32.mrf.mxu0 }
  0x9a   : > { %v496_v47 = vsel %vm66_vm0, %v1934_v43, 0.0 }
  0x9f   : > { %116 = vadd.xlane.f32.xlu0 %v115_v12 }
  0xa7   : > { %497 = vadd.xlane.f32.xlu0 %v496_v47 }
 0x10a   : > { %v208_v25 = vpop.xlane.xlu0 %207 }
 0x10b   : > { %v209_v26 = vmul.f32 %v208_v25, %v1927_v24 }
 0x10d   : > { %v210_v27 = vsub.f32 %v203_v9, %v209_v26  ;;  %v173_v26 = vadd.f32 %v172_v22, %v171_v20  ;;  %v1620_v20 = vld [vmem:[%s2359_s7] ss:$0 sm:$0xff] }
 0x10f   : > { %v211_v28 = vmul.f32 %v210_v27, %v210_v27 }
 0x111   : > { %v212_v29 = vsel %vm66_vm0, %v211_v28, 0.0  ;;  %v174_v28 = vsel %vm66_vm0, %v168_v23, 0.0 }
 0x112   : > { %213 = vadd.xlane.f32.xlu1 %v212_v29  ;;  %v117_v30 = vpop.xlane.xlu0 %116 }
 0x113   : > { %v125_v31 = vmul.f32 %v1927_v24, %v117_v30 }
 0x115   : > { %v126_v32 = vsub.f32 %v112_v11, %v125_v31  ;;  %v175_v31 = vadd.f32 %v174_v28, %v173_v26  ;;  %v1621_v26 = vld [vmem:[%s2360_s8] ss:$0 sm:$0xff] }
 0x117   : > { %v127_v33 = vmul.f32 %v126_v32, %v126_v32  ;;  %v176_v36 = vmul.f32 0.25, %v175_v31 }
 0x119   : > { %v128_v34 = vsel %vm66_vm0, %v127_v33, 0.0 }
 0x11a   : > { %129 = vadd.xlane.f32.xlu1 %v128_v34  ;;  %v498_v44 = vpop.xlane.xlu0 %497 }
 0x11b   : > { %v499_v45 = vmul.f32 %v498_v44, %v1927_v24 }
 0x185   : > { %v214_v37 = vpop.xlane.xlu1 %213 }
 0x186   : > { %v215_v38 = vmul.f32 %v214_v37, %v1927_v24 }
 0x188   : > { %v216_v40 = vadd.f32 1e-05, %v215_v38 }
 0x18a   : > { %1630 = vrsqrt.f32 %v216_v40  ;;  %vm223_vm4 = vweird.f32 %v216_v40 }
 0x18d   : > { %v130_v42 = vpop.xlane.xlu1 %129 }
 0x18e   : > { %v131_v46 = vmul.f32 %v130_v42, %v1927_v24 }
 0x190   : > { %v1631_v49 = vpop.eup %1630  ;;  %v132_v50 = vadd.f32 1e-05, %v131_v46  ;;  %v1975_v46 = vsub.f32 %v1934_v43, %v499_v45 }
 0x191   : > { %v218_v51 = vmul.f32 %v1631_v49, %v216_v40  ;;  %vm224_vm3 = vweird.f32 %v1631_v49 }
 0x192   : > { %1632 = vrsqrt.f32 %v132_v50  ;;  %vm225_vm5 = vmor %vm223_vm4, %vm224_vm3  ;;  %vm139_vm7 = vweird.f32 %v132_v50  ;;  %v501_v47 = vmul.f32 %v1975_v46, %v1975_v46 }
 0x193   : > { %v219_v53 = vmul.f32 %v1631_v49, %v218_v51 }
 0x194   : > { %v502_v48 = vsel %vm66_vm0, %v501_v47, 0.0 }
 0x195   : > { %v220_v54 = vmul.f32 0.5, %v219_v53  ;;  %503 = vadd.xlane.f32.xlu0 %v502_v48 }
 0x197   : > { %v221_v55 = vsub.f32 1.5, %v220_v54 }
 0x198   : > { %v1633_v56 = vpop.eup %1632 }
 0x199   : > { %v222_v57 = vmul.f32 %v1631_v49, %v221_v55  ;;  %v134_v58 = vmul.f32 %v1633_v56, %v132_v50  ;;  %vm140_vm6 = vweird.f32 %v1633_v56 }
 0x19a   : > { %vm141_vm8 = vmor %vm139_vm7, %vm140_vm6 }
 0x19b   : > { %v226_v60 = vsel %vm225_vm5, %v1631_v49, %v222_v57  ;;  %v135_v61 = vmul.f32 %v1633_v56, %v134_v58 }
 0x19c   : > { %v227_v63 = vmul.f32 %v226_v60, %v210_v27 }
 0x19d   : > { %v136_v0 = vmul.f32 0.5, %v135_v61 }
 0x19e   : > { %v231_v1 = vmul.f32 %v1614_v59, %v227_v63 }
 0x19f   : > { %v137_v2 = vsub.f32 1.5, %v136_v0 }
 0x1a0   : > { %v235_v3 = vadd.f32 %v1615_v62, %v231_v1 }
 0x1a1   : > { %v138_v4 = vmul.f32 %v1633_v56, %v137_v2 }
 0x1a2   : > { %v1514_v5 = vmul.f32 -1.442695, %v235_v3 }
 0x1a3   : > { %v142_v7 = vsel %vm141_vm8, %v1633_v56, %v138_v4 }
 0x1a4   : > { %1634 = vpow2.f32 %v1514_v5  ;;  %v143_v9 = vmul.f32 %v142_v7, %v126_v32 }
 0x1a6   : > { %v147_v11 = vmul.f32 %v1616_v6, %v143_v9 }
 0x1a8   : > { %v1963_v12 = vadd.f32 %v1617_v10, %v147_v11 }
 0x1aa   : > { %v1635_v13 = vpop.eup %1634  ;;  %1516 = vmatmul.msk.f32.vlgmr.msra.gmra.mxu3 %vm66_vm0, %v1963_v12 }
 0x1ab   : > { %v239_v16 = vadd.f32 1.0, %v1635_v13 }
 0x1ad   : > { %1636 = vrcp.f32 %v239_v16  ;;  %v251_v30 = vand.u32 2147483648, %v239_v16  ;;  %v249_v33 = vand.u32 2147483647, %v239_v16  ;;  %vm245_vm10 = vweird.f32 %v239_v16 }
 0x1ae   : > { %1638 = vrcp.f32 %v1777_v52  ;;  %v1618_v52 = vld [vmem:[%s2362_s10 + $0x1] ss:$0 sm:$0xff] }
 0x1af   : > { %v252_v35 = vor.u32 1.1754944e-38, %v251_v30  ;;  %vm250_vm12 = vcmp.eq.f32.partialorder %v249_v33, 8.507059e+37 }
 0x1b3   : > { %v1637_v25 = vpop.eup %1636 }
 0x1b4   : > { %v241_v27 = vmul.f32 %v1637_v25, %v239_v16  ;;  %vm246_vm9 = vweird.f32 %v1637_v25  ;;  %v1639_v53 = vpop.eup %1638 }
 0x1b5   : > { %vm247_vm11 = vmor %vm245_vm10, %vm246_vm9  ;;  %v293_v43 = vmul.f32 96.0, %v1639_v53  ;;  %vm297_vm14 = vweird.f32 %v1639_v53 }
 0x1b6   : > { %v242_v29 = vsub.f32 1.0, %v241_v27 }
 0x1b7   : > { %v294_v54 = vsub.f32 1.0, %v293_v43 }
 0x1b8   : > { %v243_v32 = vmul.f32 %v1637_v25, %v242_v29 }
 0x1b9   : > { %v295_v55 = vmul.f32 %v1639_v53, %v294_v54  ;;  %v1619_v54 = vld [vmem:[%s2363_s11 + $0x1] ss:$0 sm:$0xff] }
 0x1ba   : > { %v244_v34 = vadd.f32 %v1637_v25, %v243_v32  ;;  %v1622_v32 = vld [vmem:[%s2365_s13] ss:$0 sm:$0xff] }
 0x1bb   : > { %v296_v56 = vadd.f32 %v1639_v53, %v295_v55 }
 0x1bc   : > { %v248_v37 = vsel %vm247_vm11, %v1637_v25, %v244_v34 }
 0x1bd   : > { %v253_v38 = vsel %vm250_vm12, %v252_v35, %v248_v37  ;;  %v1982_v57 = vsel %vm297_vm14, %v1639_v53, %v296_v56  ;;  %v1623_v35 = vld [vmem:[%s2366_s14] ss:$0 sm:$0xff] }
 0x1be   : > { %v256_v39 = vsub.f32 1.0, %v253_v38  ;;  %v255_v40 = vmul.f32 %v253_v38, %v1904_v8 }
 0x1c0   : > { %v257_v41 = vmul.f32 %v256_v39, %v176_v36 }
 0x1c2   : > { %v258_v42 = vadd.f32 %v257_v41, %v255_v40 }
 0x1c4   : > { %1515 = vmatmul.msk.f32.vlgmr.msra.gmra.mxu2 %vm66_vm0, %v258_v42 }
 0x208   : > { %v504_v38 = vpop.xlane.xlu0 %503 }
 0x209   : > { %v505_v39 = vmul.f32 %v504_v38, %v1927_v24 }
 0x20b   : > { %v506_v40 = vadd.f32 1e-05, %v505_v39 }
 0x20d   : > { %vm513_vm7 = vweird.f32 %v506_v40 }
 0x22d   : > { %v352_v50 = vpop.f32.mrf.mxu3 }
 0x22e   : > { %v355_v51 = vsel %vm288_vm13, %v352_v50, 0.0 }
 0x247   : > { %v285_v49 = vpop.f32.mrf.mxu2 }
 0x248   : > { %v289_v8 = vsel %vm288_vm13, %v285_v49, 0.0 }
 0x249   : > { %290 = vadd.xlane.f32.xlu2 %v289_v8 }
 0x251   : > { %356 = vadd.xlane.f32.xlu2 %v355_v51 }
 0x2bc   : > { %v291_v58 = vpop.xlane.xlu2 %290 }
 0x2bd   : > { %v299_v59 = vmul.f32 %v1982_v57, %v291_v58 }
 0x2bf   : > { %v300_v60 = vsub.f32 %v285_v49, %v299_v59 }
 0x2c1   : > { %v301_v61 = vmul.f32 %v300_v60, %v300_v60 }
 0x2c3   : > { %v302_v62 = vsel %vm288_vm13, %v301_v61, 0.0 }
 0x2c4   : > { %303 = vadd.xlane.f32.xlu1 %v302_v62  ;;  %v357_v63 = vpop.xlane.xlu2 %356  ;;  %v615_v62 = vld [vmem:[#allocation4 + $0x38] sm:$0xff] }
 0x2c5   : > { %v358_v0 = vmul.f32 %v357_v63, %v1982_v57  ;;  %v614_v63 = vld [vmem:[#allocation4 + $0x30] sm:$0xff]  ;;  %635 = vmatpush.msrb.mxu2 %v615_v62 }
 0x2c7   : > { %v359_v1 = vsub.f32 %v352_v50, %v358_v0  ;;  %636 = vmatpush.msrb.mxu2 %v614_v63  ;;  %v613_v0 = vld [vmem:[#allocation4 + $0x28] sm:$0xff] }
 0x2c9   : > { %v360_v2 = vmul.f32 %v359_v1, %v359_v1  ;;  %637 = vmatpush.msrb.mxu2 %v613_v0 }
 0x2cb   : > { %v361_v3 = vsel %vm288_vm13, %v360_v2, 0.0 }
 0x2cc   : > { %362 = vadd.xlane.f32.xlu2 %v361_v3  ;;  %v1531_v3 = vld [vmem:[%s2358_s6 + $0x38] sm:$0xff] }
 0x2cd   : > { %573 = vmatpush.msrb.mxu1 %v1531_v3 }
 0x337   : > { %v304_v4 = vpop.xlane.xlu1 %303 }
 0x338   : > { %v305_v5 = vmul.f32 %v304_v4, %v1982_v57  ;;  %v1530_v4 = vld [vmem:[%s2358_s6 + $0x30] sm:$0xff] }
 0x339   : > { %574 = vmatpush.msrb.mxu1 %v1530_v4 }
 0x33a   : > { %v306_v6 = vadd.f32 1e-05, %v305_v5 }
 0x33c   : > { %1640 = vrsqrt.f32 %v306_v6  ;;  %vm313_vm2 = vweird.f32 %v306_v6 }
 0x33f   : > { %v363_v7 = vpop.xlane.xlu2 %362 }
 0x340   : > { %v364_v9 = vmul.f32 %v363_v7, %v1982_v57  ;;  %v1529_v7 = vld [vmem:[%s2358_s6 + $0x28] sm:$0xff] }
 0x341   : > { %575 = vmatpush.msrb.mxu1 %v1529_v7 }
 0x342   : > { %v1641_v10 = vpop.eup %1640  ;;  %v365_v11 = vadd.f32 1e-05, %v364_v9 }
 0x343   : > { %v308_v13 = vmul.f32 %v1641_v10, %v306_v6  ;;  %vm314_vm15 = vweird.f32 %v1641_v10 }
 0x344   : > { %1642 = vrsqrt.f32 %v365_v11  ;;  %vm315_vm3 = vmor %vm313_vm2, %vm314_vm15  ;;  %vm372_vm5 = vweird.f32 %v365_v11 }
 0x345   : > { %v309_v14 = vmul.f32 %v1641_v10, %v308_v13  ;;  %1644 = vrsqrt.f32 %v506_v40 }
 0x347   : > { %v310_v15 = vmul.f32 0.5, %v309_v14 }
 0x349   : > { %v311_v16 = vsub.f32 1.5, %v310_v15 }
 0x34a   : > { %v1643_v17 = vpop.eup %1642 }
 0x34b   : > { %v312_v18 = vmul.f32 %v1641_v10, %v311_v16  ;;  %v367_v19 = vmul.f32 %v1643_v17, %v365_v11  ;;  %vm373_vm4 = vweird.f32 %v1643_v17  ;;  %v1645_v41 = vpop.eup %1644  ;;  %v1528_v11 = vld [vmem:[%s2358_s6 + $0x20] sm:$0xff] }
 0x34c   : > { %vm374_vm6 = vmor %vm372_vm5, %vm373_vm4  ;;  %v508_v42 = vmul.f32 %v1645_v41, %v506_v40  ;;  %vm514_vm8 = vweird.f32 %v1645_v41  ;;  %576 = vmatpush.msrb.mxu1 %v1528_v11 }
 0x34d   : > { %v316_v22 = vsel %vm315_vm3, %v1641_v10, %v312_v18  ;;  %v368_v23 = vmul.f32 %v1643_v17, %v367_v19  ;;  %vm515_vm9 = vmor %vm513_vm7, %vm514_vm8 }
 0x34e   : > { %v317_v25 = vmul.f32 %v316_v22, %v300_v60  ;;  %v509_v44 = vmul.f32 %v1645_v41, %v508_v42 }
 0x34f   : > { %v369_v27 = vmul.f32 0.5, %v368_v23 }
 0x350   : > { %v321_v28 = vmul.f32 %v1620_v20, %v317_v25  ;;  %v510_v45 = vmul.f32 0.5, %v509_v44 }
 0x351   : > { %v370_v29 = vsub.f32 1.5, %v369_v27 }
 0x352   : > { %v325_v30 = vadd.f32 %v1621_v26, %v321_v28  ;;  %v511_v47 = vsub.f32 1.5, %v510_v45 }
 0x353   : > { %v371_v31 = vmul.f32 %v1643_v17, %v370_v29 }
 0x354   : > { %424 = vrot.lane.b32.xlu1 %v325_v30, %s1778_s26  ;;  %v1517_v48 = vmul.f32 -1.442695, %v325_v30  ;;  %v512_v49 = vmul.f32 %v1645_v41, %v511_v47 }
 0x355   : > { %v375_v33 = vsel %vm374_vm6, %v1643_v17, %v371_v31 }
 0x356   : > { %v376_v34 = vmul.f32 %v375_v33, %v359_v1  ;;  %1646 = vpow2.f32 %v1517_v48  ;;  %v516_v8 = vsel %vm515_vm9, %v1645_v41, %v512_v49  ;;  %v612_v1 = vld [vmem:[#allocation4 + $0x20] sm:$0xff] }
 0x357   : > { %v517_v53 = vmul.f32 %v516_v8, %v1975_v46  ;;  %638 = vmatpush.msrb.mxu2 %v612_v1 }
 0x358   : > { %v380_v36 = vmul.f32 %v1622_v32, %v376_v34 }
 0x359   : > { %v521_v55 = vmul.f32 %v1618_v52, %v517_v53 }
 0x35a   : > { %v384_v37 = vadd.f32 %v1623_v35, %v380_v36 }
 0x35b   : > { %v525_v58 = vadd.f32 %v1619_v54, %v521_v55 }
 0x35c   : > { %430 = vrot.lane.b32.xlu2 %v384_v37, %s1778_s26  ;;  %435 = vrot.lane.b32.xlu0 %v384_v37, %s1779_s16  ;;  %v1518_v50 = vmul.f32 -1.442695, %v384_v37  ;;  %v1647_v51 = vpop.eup %1646 }
 0x35d   : > { %v388_v43 = vadd.f32 1.0, %v1647_v51  ;;  %v1527_v60 = vmul.f32 -1.442695, %v525_v58 }
 0x35e   : > { %1648 = vpow2.f32 %v1518_v50  ;;  %v1627_v50 = vld [vmem:[%s2360_s8 + $0x1] ss:$0 sm:$0xff] }
 0x35f   : > { %1650 = vrcp.f32 %v388_v43  ;;  %v400_v16 = vand.u32 2147483648, %v388_v43  ;;  %vm394_vm11 = vweird.f32 %v388_v43  ;;  %v398_v17 = vand.u32 2147483647, %v388_v43 }
 0x361   : > { %v401_v20 = vor.u32 1.1754944e-38, %v400_v16  ;;  %vm399_vm14 = vcmp.eq.f32.partialorder %v398_v17, 8.507059e+37 }
 0x364   : > { %440 = vrot.lane.b32.xlu2 %v325_v30, %s1779_s16  ;;  %v1649_v56 = vpop.eup %1648 }
 0x365   : > { %v2014_v59 = vadd.f32 1.0, %v1649_v56  ;;  %v1651_v61 = vpop.eup %1650 }
 0x366   : > { %v390_v46 = vmul.f32 %v1651_v61, %v388_v43  ;;  %vm395_vm10 = vweird.f32 %v1651_v61 }
 0x367   : > { %1652 = vrcp.f32 %v2014_v59  ;;  %vm396_vm12 = vmor %vm394_vm11, %vm395_vm10  ;;  %v419_v27 = vand.u32 2147483648, %v2014_v59  ;;  %vm413_vm2 = vweird.f32 %v2014_v59  ;;  %v417_v29 = vand.u32 2147483647, %v2014_v59 }
 0x368   : > { %1654 = vpow2.f32 %v1527_v60  ;;  %v391_v2 = vsub.f32 1.0, %v390_v46 }
 0x369   : > { %v420_v35 = vor.u32 1.1754944e-38, %v419_v27  ;;  %vm418_vm4 = vcmp.eq.f32.partialorder %v417_v29, 8.507059e+37 }
 0x36a   : > { %v392_v9 = vmul.f32 %v1651_v61, %v391_v2 }
 0x36c   : > { %v393_v14 = vadd.f32 %v1651_v61, %v392_v9 }
 0x36d   : > { %v1653_v5 = vpop.eup %1652 }
 0x36e   : > { %v1655_v6 = vpop.eup %1654  ;;  %v409_v10 = vmul.f32 %v1653_v5, %v2014_v59  ;;  %v397_v18 = vsel %vm396_vm12, %v1651_v61, %v393_v14  ;;  %vm414_vm15 = vweird.f32 %v1653_v5 }
 0x36f   : > { %v2033_v13 = vadd.f32 1.0, %v1655_v6  ;;  %v402_v25 = vsel %vm399_vm14, %v401_v20, %v397_v18  ;;  %vm415_vm3 = vmor %vm413_vm2, %vm414_vm15 }
 0x370   : > { %v410_v15 = vsub.f32 1.0, %v409_v10  ;;  %v428_v28 = vsub.f32 1.0, %v402_v25 }
 0x371   : > { %1656 = vrcp.f32 %v2033_v13  ;;  %vm535_vm5 = vweird.f32 %v2033_v13  ;;  %v541_v47 = vand.u32 2147483648, %v2033_v13  ;;  %v539_v8 = vand.u32 2147483647, %v2033_v13 }
 0x372   : > { %v411_v19 = vmul.f32 %v1653_v5, %v410_v15 }
 0x373   : > { %v542_v55 = vor.u32 1.1754944e-38, %v541_v47  ;;  %vm540_vm8 = vcmp.eq.f32.partialorder %v539_v8, 8.507059e+37 }
 0x374   : > { %v412_v26 = vadd.f32 %v1653_v5, %v411_v19 }
 0x376   : > { %v416_v33 = vsel %vm415_vm3, %v1653_v5, %v412_v26 }
 0x377   : > { %v1657_v22 = vpop.eup %1656  ;;  %v421_v38 = vsel %vm418_vm4, %v420_v35, %v416_v33 }
 0x378   : > { %v531_v30 = vmul.f32 %v1657_v22, %v2033_v13  ;;  %v439_v40 = vsub.f32 1.0, %v421_v38  ;;  %vm536_vm6 = vweird.f32 %v1657_v22 }
 0x379   : > { %vm2048_vm7 = vmor %vm535_vm5, %vm536_vm6 }
 0x37a   : > { %v532_v37 = vsub.f32 1.0, %v531_v30 }
 0x37c   : > { %v533_v41 = vmul.f32 %v1657_v22, %v532_v37 }
 0x37e   : > { %v534_v49 = vadd.f32 %v1657_v22, %v533_v41 }
 0x380   : > { %v538_v59 = vsel %vm2048_vm7, %v1657_v22, %v534_v49 }
 0x381   : > { %v543_v63 = vsel %vm540_vm8, %v542_v55, %v538_v59  ;;  %v741_v59 = vld [vmem:[%s2357_s5 + $0x10] sm:$0xff] }
 0x382   : > { %v546_v1 = vsub.f32 1.0, %v543_v63  ;;  %v545_v2 = vmul.f32 %v543_v63, %v1923_v21 }
 0x3b6   : > { %v431_v23 = vpop.permute.xlu2 %430 }
 0x3b7   : > { %v433_v32 = vmul.f32 %v431_v23, %v428_v28 }
 0x3be   : > { %v441_v39 = vpop.permute.xlu2 %440 }
 0x3bf   : > { %v443_v44 = vmul.f32 %v441_v39, %v439_v40  ;;  %v1625_v40 = vld [vmem:[%s2366_s14 + $0x1] ss:$0 sm:$0xff] }
 0x3c6   : > { %v425_v31 = vpop.permute.xlu1 %424 }
 0x3c7   : > { %v427_v34 = vmul.f32 %v425_v31, %v402_v25 }
 0x3c9   : > { %v434_v36 = vadd.f32 %v433_v32, %v427_v34 }
 0x3cb   : > { %445 = vst.msk [vmem:[#allocation2] sm:$0xff] %vm66_vm0, %v434_v36 }
 0x3cc   : > { %448 = vst.msk [vmem:[%s2041_s24] sm:$0xff] %vm66_vm0, %v434_v36  ;;  %v1624_v36 = vld [vmem:[%s2365_s13 + $0x1] ss:$0 sm:$0xff] }
 0x3ce   : > { %v436_v42 = vpop.permute.xlu0 %435 }
 0x3cf   : > { %v438_v45 = vmul.f32 %v436_v42, %v421_v38 }
 0x3d1   : > { %v444_v48 = vadd.f32 %v443_v44, %v438_v45 }
 0x3d3   : > { %1537 = vmatmul.msk.f32.vlgmr.msrb.gmra.mxu2 %vm66_vm0, %v444_v48  ;;  %v452_v51 = vld [vmem:[#allocation3 + $0x20] sm:$0xff]  ;;  %v453_v52 = vld [vmem:[#allocation3 + $0x28] sm:$0xff]  ;;  %v454_v53 = vld [vmem:[#allocation3 + $0x30] sm:$0xff] }
 0x3d4   : > { %v456_v43 = vsel %vm66_vm0, %v452_v51, 0.0  ;;  %v457_v54 = vsel %vm66_vm0, %v453_v52, 0.0  ;;  %v455_v56 = vld [vmem:[#allocation3 + $0x38] sm:$0xff]  ;;  %v459_v60 = vsel %vm66_vm0, %v454_v53, 0.0  ;;  %v1626_v48 = vld [vmem:[%s2359_s7 + $0x1] ss:$0 sm:$0xff] }
 0x3d5   : > { %v458_v58 = vadd.f32 %v457_v54, %v456_v43  ;;  %v461_v62 = vsel %vm66_vm0, %v455_v56, 0.0  ;;  %v742_v43 = vld [vmem:[%s2357_s5 + $0x18] sm:$0xff] }
 0x3d6   : > { %758 = vmatpush.msrb.mxu3 %v742_v43 }
 0x3d7   : > { %v460_v61 = vadd.f32 %v459_v60, %v458_v58  ;;  %v740_v60 = vld [vmem:[%s2357_s5 + $0x8] sm:$0xff] }
 0x3d8   : > { %759 = vmatpush.msrb.mxu3 %v741_v59 }
 0x3d9   : > { %v462_v46 = vadd.f32 %v461_v62, %v460_v61  ;;  %v739_v62 = vld [vmem:[%s2357_s5] sm:$0xff] }
 0x3da   : > { %760 = vmatpush.msrb.mxu3 %v740_v60 }
 0x3db   : > { %v463_v0 = vmul.f32 0.25, %v462_v46 }
 0x3dc   : > { %761 = vmatpush.msrb.mxu3 %v739_v62 }
 0x3dd   : > { %v547_v3 = vmul.f32 %v546_v1, %v463_v0 }
 0x3df   : > { %v548_v4 = vadd.f32 %v547_v3, %v545_v2 }
 0x3e1   : > { %1534 = vmatmul.msk.f32.vlgmr.msrb.gmra.mxu1 %vm66_vm0, %v548_v4 }
 0x456   : > { %v640_v5 = vpop.f32.mrf.mxu2 }
 0x457   : > { %v643_v6 = vsel %vm288_vm13, %v640_v5, 0.0 }
 0x458   : > { %644 = vadd.xlane.f32.xlu0 %v643_v6 }
 0x45e   : > { %v578_v7 = vpop.f32.mrf.mxu1 }
 0x45f   : > { %v581_v9 = vsel %vm288_vm13, %v578_v7, 0.0 }
 0x460   : > { %582 = vadd.xlane.f32.xlu1 %v581_v9 }
 0x4cb   : > { %v645_v10 = vpop.xlane.xlu0 %644 }
 0x4cc   : > { %v646_v11 = vmul.f32 %v645_v10, %v1982_v57 }
 0x4ce   : > { %v647_v13 = vsub.f32 %v640_v5, %v646_v11 }
 0x4d0   : > { %v648_v14 = vmul.f32 %v647_v13, %v647_v13 }
 0x4d2   : > { %v649_v15 = vsel %vm288_vm13, %v648_v14, 0.0 }
 0x4d3   : > { %v583_v21 = vpop.xlane.xlu1 %582  ;;  %650 = vadd.xlane.f32.xlu1 %v649_v15 }
 0x4d4   : > { %v584_v16 = vmul.f32 %v583_v21, %v1982_v57 }
 0x4d6   : > { %v585_v17 = vsub.f32 %v578_v7, %v584_v16 }
 0x4d8   : > { %v586_v18 = vmul.f32 %v585_v17, %v585_v17 }
 0x4da   : > { %v587_v19 = vsel %vm288_vm13, %v586_v18, 0.0 }
 0x4db   : > { %588 = vadd.xlane.f32.xlu2 %v587_v19 }
 0x546   : > { %v651_v20 = vpop.xlane.xlu1 %650 }
 0x547   : > { %v652_v22 = vmul.f32 %v651_v20, %v1982_v57 }
 0x549   : > { %v653_v23 = vadd.f32 1e-05, %v652_v22 }
 0x54b   : > { %1658 = vrsqrt.f32 %v653_v23  ;;  %vm660_vm10 = vweird.f32 %v653_v23 }
 0x54e   : > { %v589_v25 = vpop.xlane.xlu2 %588 }
 0x54f   : > { %v590_v26 = vmul.f32 %v589_v25, %v1982_v57 }
 0x551   : > { %v1659_v27 = vpop.eup %1658  ;;  %v591_v28 = vadd.f32 1e-05, %v590_v26 }
 0x552   : > { %v655_v29 = vmul.f32 %v1659_v27, %v653_v23  ;;  %vm661_vm9 = vweird.f32 %v1659_v27 }
 0x553   : > { %1660 = vrsqrt.f32 %v591_v28  ;;  %vm662_vm11 = vmor %vm660_vm10, %vm661_vm9  ;;  %vm598_vm14 = vweird.f32 %v591_v28 }
 0x554   : > { %v656_v30 = vmul.f32 %v1659_v27, %v655_v29 }
 0x556   : > { %v657_v31 = vmul.f32 0.5, %v656_v30 }
 0x558   : > { %v658_v32 = vsub.f32 1.5, %v657_v31 }
 0x559   : > { %v1661_v33 = vpop.eup %1660 }
 0x55a   : > { %v659_v34 = vmul.f32 %v1659_v27, %v658_v32  ;;  %v593_v35 = vmul.f32 %v1661_v33, %v591_v28  ;;  %vm599_vm12 = vweird.f32 %v1661_v33 }
 0x55b   : > { %vm600_vm15 = vmor %vm598_vm14, %vm599_vm12 }
 0x55c   : > { %v663_v37 = vsel %vm662_vm11, %v1659_v27, %v659_v34  ;;  %v594_v38 = vmul.f32 %v1661_v33, %v593_v35 }
 0x55d   : > { %v664_v39 = vmul.f32 %v663_v37, %v647_v13 }
 0x55e   : > { %v595_v41 = vmul.f32 0.5, %v594_v38 }
 0x55f   : > { %v668_v42 = vmul.f32 %v1624_v36, %v664_v39 }
 0x560   : > { %v596_v44 = vsub.f32 1.5, %v595_v41 }
 0x561   : > { %v672_v45 = vadd.f32 %v1625_v40, %v668_v42 }
 0x562   : > { %v597_v47 = vmul.f32 %v1661_v33, %v596_v44 }
 0x563   : > { %723 = vrot.lane.b32.xlu0 %v672_v45, %s1779_s16  ;;  %v1539_v53 = vmul.f32 -1.442695, %v672_v45 }
 0x564   : > { %v601_v49 = vsel %vm600_vm15, %v1661_v33, %v597_v47 }
 0x565   : > { %v602_v8 = vmul.f32 %v601_v49, %v585_v17  ;;  %1662 = vpow2.f32 %v1539_v53 }
 0x567   : > { %v606_v51 = vmul.f32 %v1626_v48, %v602_v8 }
 0x569   : > { %v610_v52 = vadd.f32 %v1627_v50, %v606_v51 }
 0x56b   : > { %728 = vrot.lane.b32.xlu2 %v610_v52, %s1779_s16  ;;  %712 = vrot.lane.b32.xlu1 %v610_v52, %s1778_s26  ;;  %v1538_v54 = vmul.f32 -1.442695, %v610_v52  ;;  %v1663_v55 = vpop.eup %1662 }
 0x56c   : > { %718 = vrot.lane.b32.xlu0 %v672_v45, %s1778_s26  ;;  %v695_v56 = vadd.f32 1.0, %v1663_v55 }
 0x56d   : > { %1664 = vpow2.f32 %v1538_v54 }
 0x56e   : > { %1666 = vrcp.f32 %v695_v56  ;;  %v707_v5 = vand.u32 2147483648, %v695_v56  ;;  %vm701_vm3 = vweird.f32 %v695_v56  ;;  %v705_v7 = vand.u32 2147483647, %v695_v56 }
 0x570   : > { %v708_v10 = vor.u32 1.1754944e-38, %v707_v5  ;;  %vm706_vm5 = vcmp.eq.f32.partialorder %v705_v7, 8.507059e+37 }
 0x573   : > { %v1665_v58 = vpop.eup %1664 }
 0x574   : > { %v676_v61 = vadd.f32 1.0, %v1665_v58  ;;  %v1667_v63 = vpop.eup %1666 }
 0x575   : > { %v697_v46 = vmul.f32 %v1667_v63, %v695_v56  ;;  %vm702_vm2 = vweird.f32 %v1667_v63 }
 0x576   : > { %1668 = vrcp.f32 %v676_v61  ;;  %vm703_vm4 = vmor %vm701_vm3, %vm702_vm2  ;;  %v688_v16 = vand.u32 2147483648, %v676_v61  ;;  %vm682_vm7 = vweird.f32 %v676_v61  ;;  %v686_v18 = vand.u32 2147483647, %v676_v61 }
 0x577   : > { %v698_v0 = vsub.f32 1.0, %v697_v46 }
 0x578   : > { %v689_v25 = vor.u32 1.1754944e-38, %v688_v16  ;;  %vm687_vm9 = vcmp.eq.f32.partialorder %v686_v18, 8.507059e+37 }
 0x579   : > { %v699_v2 = vmul.f32 %v1667_v63, %v698_v0 }
 0x57b   : > { %v700_v4 = vadd.f32 %v1667_v63, %v699_v2 }
 0x57c   : > { %v1669_v1 = vpop.eup %1668 }
 0x57d   : > { %v678_v3 = vmul.f32 %v1669_v1, %v676_v61  ;;  %v704_v9 = vsel %vm703_vm4, %v1667_v63, %v700_v4  ;;  %vm683_vm6 = vweird.f32 %v1669_v1 }
 0x57e   : > { %v709_v13 = vsel %vm706_vm5, %v708_v10, %v704_v9  ;;  %vm684_vm8 = vmor %vm682_vm7, %vm683_vm6 }
 0x57f   : > { %v679_v6 = vsub.f32 1.0, %v678_v3  ;;  %v727_v21 = vsub.f32 1.0, %v709_v13 }
 0x581   : > { %v680_v11 = vmul.f32 %v1669_v1, %v679_v6 }
 0x583   : > { %v681_v15 = vadd.f32 %v1669_v1, %v680_v11 }
 0x585   : > { %v685_v22 = vsel %vm684_vm8, %v1669_v1, %v681_v15 }
 0x586   : > { %v690_v27 = vsel %vm687_vm9, %v689_v25, %v685_v22 }
 0x587   : > { %v716_v29 = vsub.f32 1.0, %v690_v27 }
 0x5c5   : > { %v729_v14 = vpop.permute.xlu2 %728 }
 0x5c6   : > { %v731_v19 = vmul.f32 %v729_v14, %v727_v21 }
 0x5d5   : > { %v724_v17 = vpop.permute.xlu0 %723 }
 0x5d6   : > { %v726_v20 = vmul.f32 %v724_v17, %v709_v13 }
 0x5d8   : > { %v732_v23 = vadd.f32 %v731_v19, %v726_v20 }
 0x5da   : > { %v738_v26 = vadd.f32 %v732_v23, %v1963_v12 }
 0x5dc   : > { %1542 = vmatmul.msk.f32.vlgmr.msrb.gmra.mxu3 %vm66_vm0, %v738_v26 }
 0x5dd   : > { %v713_v28 = vpop.permute.xlu1 %712 }
 0x5de   : > { %v715_v30 = vmul.f32 %v713_v28, %v690_v27  ;;  %v719_v31 = vpop.permute.xlu0 %718 }
 0x5df   : > { %v721_v32 = vmul.f32 %v719_v31, %v716_v29 }
 0x5e1   : > { %v722_v33 = vadd.f32 %v721_v32, %v715_v30 }
 0x5e3   : > { %733 = vst.msk [vmem:[#allocation2 + $0x8] sm:$0xff] %vm66_vm0, %v722_v33 }
 0x5e4   : > { %1541 = vst.msk [vmem:[%s2041_s24 + $0x20] sm:$0xff] %vm66_vm0, %v722_v33 }
 0x65c   :  { %81 = sbr.rel (!%p79_p2) target bundleno = 16 (0x10), region = 129 }
 0x65f   : > { %v763_v34 = vpop.f32.mrf.mxu3  }
 0x660   : > { %767 = vst.msk [vmem:[%s766_s17] sm:$0xff] %vm91_vm1, %v763_v34 }
 0x661 LB: > { %v879_v12 = vld [vmem:[%s2361_s9 + $0x18] sm:$0xff]  ;;  %v878_v35 = vld [vmem:[%s2361_s9 + $0x10] sm:$0xff]  ;;  %v877_v36 = vld [vmem:[%s2361_s9 + $0x8] sm:$0xff]  ;;  %s1543_s29 = sadd.s32 4294967292, %s1770_s18  ;;  %s1545_s30 = sshll.u32 %s1770_s18, 3  ;;  %s1770_s18 = sphi %s2113_s18, %s773_s18   ;;  %v1766_v34 = vphi %v763_v34, %v1462_v34  }
 0x662   : > { %897 = vmatpush.msra.mxu1 %v879_v12  ;;  %v787_v37 = vld [vmem:[%s2354_s2 + $0x8] sm:$0xff]  ;;  %v876_v38 = vld [vmem:[%s2361_s9] sm:$0xff]  ;;  %s1544_s17 = sshll.u32 %s1543_s29, 3  ;;  %s780_s12 = scalar_lea.vmem %s2352_s0, %s1545_s30  ;;  %v1560_v52 = vld [vmem:[%s2361_s9 + $0x38] sm:$0xff] }
 0x663   : > { %808 = vmatpush.msra.mxu0 %v787_v37  ;;  %v786_v39 = vld [vmem:[%s2354_s2] sm:$0xff]  ;;  %s777_s22 = scalar_lea.vmem %s2353_s1, %s1544_s17  ;;  %v1559_v53 = vld [vmem:[%s2361_s9 + $0x30] sm:$0xff]  ;;  %v1558_v43 = vld [vmem:[%s2361_s9 + $0x28] sm:$0xff]  ;;  %s1780_s23 = smov 96  }
 0x664   : > { %898 = vmatpush.msra.mxu1 %v878_v35  ;;  %v2139_v40 = vld [vmem:[#allocation2] sm:$0xff]  ;;  %v2166_v55 = vld [vmem:[#allocation2 + $0x8] sm:$0xff]  ;;  %v1026_v6 = vld [vmem:[#allocation4 + $0x8] sm:$0xff]  ;;  %s1781_s28 = smov 64   ;;  %p851_p3 = scmp.lt.s32.totalorder %s1770_s18, 0 }
 0x665   : > { %809 = vmatpush.msra.mxu0 %v786_v39  ;;  %v781_v41 = vld [vmem:[%s780_s12] sm:$0xff]  ;;  %v1028_v2 = vld [vmem:[#allocation4 + $0x18] sm:$0xff]  ;;  %v1025_v9 = vld [vmem:[#allocation4] sm:$0xff]  ;;  %s852_s12 = ssub.s32 0, %s1770_s18  ;;  %s1465_s29 = scalar_lea.vmem %s2367_s15, %s1545_s30 }
 0x666   : > { %899 = vmatpush.msra.mxu1 %v877_v36  ;;  %v778_v42 = vld [vmem:[%s777_s22] sm:$0xff]  ;;  %1046 = vmatpush.msra.mxu3 %v1028_v2  ;;  %v961_v13 = vld [vmem:[%s2358_s6 + $0x18] sm:$0xff]  ;;  %v960_v14 = vld [vmem:[%s2358_s6 + $0x10] sm:$0xff]  ;;  %s1547_s19 = smin.u32 %s1770_s18, %s852_s12  ;;  %s773_s18 = sadd.s32 1, %s1770_s18  }
 0x667   : > { %v782_v44 = vmul.f32 %v781_v41, %v778_v42  ;;  %v783_v45 = vsub.f32 1.0, %v778_v42  ;;  %1187 = vmatpush.msrb.mxu0 %v1560_v52  ;;  %v1557_v54 = vld [vmem:[%s2361_s9 + $0x20] sm:$0xff]  ;;  %979 = vmatpush.msra.mxu2 %v961_v13  ;;  %v959_v16 = vld [vmem:[%s2358_s6 + $0x8] sm:$0xff]  ;;  %s854_s27 = sand.u32 3, %s1547_s19   ;;  %p770_p5 = scmp.ge.s32.totalorder %s773_s18, 7  }
 0x668   : > { %900 = vmatpush.msra.mxu1 %v876_v38  ;;  %v1027_v3 = vld [vmem:[#allocation4 + $0x10] sm:$0xff]  ;;  %s855_s17 = ssub.s32 0, %s854_s27 }
 0x669   : > { %1550 = vmatmul.msk.f32.vlgmr.msra.gmra.mxu1 %vm66_vm0, %v2139_v40  ;;  %v784_v47 = vmul.f32 %v1766_v34, %v783_v45  ;;  %1188 = vmatpush.msrb.mxu0 %v1559_v53  ;;  %v958_v20 = vld [vmem:[%s2358_s6] sm:$0xff]  ;;  %s2377_s17 = smov (!%p851_p3, %s855_s17), %s854_s27 }
 0x66a   : > { %1047 = vmatpush.msra.mxu3 %v1027_v3  ;;  %980 = vmatpush.msra.mxu2 %v960_v14  ;;  %v1670_v29 = vld [vmem:[%s2362_s10] ss:$0 sm:$0xff]  ;;  %p1549_p4 = scmp.lt.s32.totalorder %s2377_s17, 0  ;;  %s861_s12 = sadd.s32 4, %s2377_s17 }
 0x66b   : > { %v785_v48 = vadd.f32 %v784_v47, %v782_v44  ;;  %1189 = vmatpush.msrb.mxu0 %v1558_v43  ;;  %v1671_v32 = vld [vmem:[%s2363_s11] ss:$0 sm:$0xff] }
 0x66c   : > { %1048 = vmatpush.msra.mxu3 %v1026_v6  ;;  %981 = vmatpush.msra.mxu2 %v959_v16  ;;  %v1672_v39 = vld [vmem:[%s2355_s3] ss:$0 sm:$0xff]  ;;  %s2379_s12 = smov (!%p1549_p4, %s861_s12), %s2377_s17 }
 0x66d   : > { %1546 = vmatmul.msk.f32.vlgmr.msra.gmra.mxu0 %vm91_vm1, %v785_v48  ;;  %v1673_v44 = vld [vmem:[%s2356_s4] ss:$0 sm:$0xff]  ;;  %s1556_s19 = sshll.u32 %s2379_s12, 3 }
 0x66e   : > { %1190 = vmatpush.msrb.mxu0 %v1557_v54  ;;  %1049 = vmatpush.msra.mxu3 %v1025_v9  ;;  %v866_v53 = vld [vmem:[#allocation3 + $0x10] sm:$0xff]  ;;  %s2280_s21 = scalar_lea.vmem [#allocation3], %s1556_s19 }
 0x66f   : > { %982 = vmatpush.msra.mxu2 %v958_v20  ;;  %v871_v54 = vsel %vm66_vm0, %v866_v53, 0.0 }
 0x675   : > { %1563 = vmatmul.msk.f32.vlgmr.msrb.gmra.mxu0 %vm66_vm0, %v2166_v55 }
 0x6e6   : > { %v902_v49 = vpop.f32.mrf.mxu1 }
 0x6e7   : > { %v905_v8 = vsel %vm66_vm0, %v902_v49, 0.0 }
 0x6e8   : > { %906 = vadd.xlane.f32.xlu0 %v905_v8  ;;  %v865_v8 = vld [vmem:[#allocation3 + $0x8] sm:$0xff] }
 0x6e9   : > { %v869_v52 = vsel %vm66_vm0, %v865_v8, 0.0 }
 0x6ea   : > { %v811_v50 = vpop.f32.mrf.mxu0 }
 0x6eb   : > { %v814_v51 = vsel %vm66_vm0, %v811_v50, 0.0 }
 0x6f0   : > { %815 = vadd.xlane.f32.xlu0 %v814_v51 }
 0x6f2   : > { %v2175_v11 = vpop.f32.mrf.mxu0 }
 0x6f3   : > { %v1195_v21 = vsel %vm66_vm0, %v2175_v11, 0.0 }
 0x6f8   : > { %1196 = vadd.xlane.f32.xlu0 %v1195_v21 }
 0x75b   : > { %v907_v56 = vpop.xlane.xlu0 %906 }
 0x75c   : > { %v908_v58 = vmul.f32 %v907_v56, %v1927_v24  ;;  %v867_v56 = vld [vmem:[#allocation3 + $0x18] sm:$0xff] }
 0x75e   : > { %v909_v59 = vsub.f32 %v902_v49, %v908_v58  ;;  %v864_v49 = vld [vmem:[#allocation3] sm:$0xff] }
 0x75f   : > { %v868_v51 = vsel %vm66_vm0, %v864_v49, 0.0  ;;  %v1676_v49 = vld [vmem:[%s2359_s7] ss:$0 sm:$0xff] }
 0x760   : > { %v910_v60 = vmul.f32 %v909_v59, %v909_v59  ;;  %v870_v43 = vadd.f32 %v869_v52, %v868_v51  ;;  %v1677_v52 = vld [vmem:[%s2360_s8] ss:$0 sm:$0xff] }
 0x762   : > { %v911_v61 = vsel %vm66_vm0, %v910_v60, 0.0 }
 0x763   : > { %912 = vadd.xlane.f32.xlu1 %v911_v61  ;;  %v816_v62 = vpop.xlane.xlu0 %815  ;;  %v873_v61 = vsel %vm66_vm0, %v867_v56, 0.0 }
 0x764   : > { %v824_v63 = vmul.f32 %v816_v62, %v1927_v24 }
 0x766   : > { %v825_v46 = vsub.f32 %v811_v50, %v824_v63 }
 0x768   : > { %v826_v0 = vmul.f32 %v825_v46, %v825_v46 }
 0x76a   : > { %v827_v1 = vsel %vm66_vm0, %v826_v0, 0.0 }
 0x76b   : > { %828 = vadd.xlane.f32.xlu1 %v827_v1  ;;  %v1197_v14 = vpop.xlane.xlu0 %1196 }
 0x7d6   : > { %v913_v4 = vpop.xlane.xlu1 %912 }
 0x7d7   : > { %v914_v5 = vmul.f32 %v913_v4, %v1927_v24 }
 0x7d9   : > { %v915_v7 = vadd.f32 1e-05, %v914_v5 }
 0x7db   : > { %1684 = vrsqrt.f32 %v915_v7  ;;  %vm922_vm11 = vweird.f32 %v915_v7 }
 0x7de   : > { %v829_v10 = vpop.xlane.xlu1 %828 }
 0x7df   : > { %v830_v15 = vmul.f32 %v829_v10, %v1927_v24 }
 0x7e1   : > { %v1685_v17 = vpop.eup %1684  ;;  %v831_v18 = vadd.f32 1e-05, %v830_v15  ;;  %v1198_v15 = vmul.f32 %v1197_v14, %v1927_v24 }
 0x7e2   : > { %v917_v19 = vmul.f32 %v1685_v17, %v915_v7  ;;  %vm923_vm10 = vweird.f32 %v1685_v17 }
 0x7e3   : > { %1686 = vrsqrt.f32 %v831_v18  ;;  %vm924_vm12 = vmor %vm922_vm11, %vm923_vm10  ;;  %vm838_vm15 = vweird.f32 %v831_v18  ;;  %v2216_v21 = vsub.f32 %v2175_v11, %v1198_v15 }
 0x7e4   : > { %v918_v22 = vmul.f32 %v1685_v17, %v917_v19 }
 0x7e5   : > { %v1200_v16 = vmul.f32 %v2216_v21, %v2216_v21 }
 0x7e6   : > { %v919_v23 = vmul.f32 0.5, %v918_v22 }
 0x7e8   : > { %v920_v25 = vsub.f32 1.5, %v919_v23 }
 0x7e9   : > { %v1687_v26 = vpop.eup %1686 }
 0x7ea   : > { %v921_v27 = vmul.f32 %v1685_v17, %v920_v25  ;;  %v833_v28 = vmul.f32 %v1687_v26, %v831_v18  ;;  %vm839_vm14 = vweird.f32 %v1687_v26 }
 0x7eb   : > { %vm840_vm2 = vmor %vm838_vm15, %vm839_vm14 }
 0x7ec   : > { %v925_v30 = vsel %vm924_vm12, %v1685_v17, %v921_v27  ;;  %v834_v31 = vmul.f32 %v1687_v26, %v833_v28  ;;  %v1201_v17 = vsel %vm66_vm0, %v1200_v16, 0.0  ;;  %v1674_v16 = vld [vmem:[%s2362_s10 + $0x1] ss:$0 sm:$0xff] }
 0x7ed   : > { %v926_v33 = vmul.f32 %v925_v30, %v909_v59  ;;  %v872_v59 = vadd.f32 %v871_v54, %v870_v43  ;;  %1202 = vadd.xlane.f32.xlu0 %v1201_v17 }
 0x7ee   : > { %v835_v34 = vmul.f32 0.5, %v834_v31 }
 0x7ef   : > { %v930_v12 = vmul.f32 %v1670_v29, %v926_v33 }
 0x7f0   : > { %v836_v35 = vsub.f32 1.5, %v835_v34 }
 0x7f1   : > { %v934_v36 = vadd.f32 %v1671_v32, %v930_v12 }
 0x7f2   : > { %v837_v37 = vmul.f32 %v1687_v26, %v836_v35 }
 0x7f3   : > { %v1551_v38 = vmul.f32 -1.442695, %v934_v36 }
 0x7f4   : > { %v841_v41 = vsel %vm840_vm2, %v1687_v26, %v837_v37 }
 0x7f5   : > { %1688 = vpow2.f32 %v1551_v38  ;;  %v842_v42 = vmul.f32 %v841_v41, %v825_v46  ;;  %v874_v46 = vadd.f32 %v873_v61, %v872_v59  ;;  %v1678_v59 = vld [vmem:[%s2365_s13] ss:$0 sm:$0xff] }
 0x7f7   : > { %v846_v45 = vmul.f32 %v1672_v39, %v842_v42  ;;  %v875_v4 = vmul.f32 0.25, %v874_v46 }
 0x7f9   : > { %v2204_v47 = vadd.f32 %v1673_v44, %v846_v45 }
 0x7fb   : > { %v1689_v48 = vpop.eup %1688  ;;  %1553 = vmatmul.msk.f32.vlgmr.msra.gmra.mxu3 %vm66_vm0, %v2204_v47 }
 0x7fc   : > { %v938_v50 = vadd.f32 1.0, %v1689_v48 }
 0x7fe   : > { %1690 = vrcp.f32 %v938_v50  ;;  %v950_v63 = vand.u32 2147483648, %v938_v50  ;;  %v948_v1 = vand.u32 2147483647, %v938_v50  ;;  %vm944_vm4 = vweird.f32 %v938_v50 }
 0x800   : > { %v951_v3 = vor.u32 1.1754944e-38, %v950_v63  ;;  %vm949_vm6 = vcmp.eq.f32.partialorder %v948_v1, 8.507059e+37 }
 0x804   : > { %v1691_v58 = vpop.eup %1690 }
 0x805   : > { %v940_v60 = vmul.f32 %v1691_v58, %v938_v50  ;;  %vm945_vm3 = vweird.f32 %v1691_v58 }
 0x806   : > { %vm946_vm5 = vmor %vm944_vm4, %vm945_vm3 }
 0x807   : > { %v941_v62 = vsub.f32 1.0, %v940_v60 }
 0x809   : > { %v942_v0 = vmul.f32 %v1691_v58, %v941_v62  ;;  %v1679_v62 = vld [vmem:[%s2366_s14] ss:$0 sm:$0xff] }
 0x80b   : > { %v943_v2 = vadd.f32 %v1691_v58, %v942_v0 }
 0x80d   : > { %v947_v5 = vsel %vm946_vm5, %v1691_v58, %v943_v2 }
 0x80e   : > { %v952_v6 = vsel %vm949_vm6, %v951_v3, %v947_v5 }
 0x80f   : > { %v955_v7 = vsub.f32 1.0, %v952_v6  ;;  %v954_v9 = vmul.f32 %v952_v6, %v2139_v40 }
 0x811   : > { %v956_v10 = vmul.f32 %v955_v7, %v875_v4 }
 0x813   : > { %v957_v13 = vadd.f32 %v956_v10, %v954_v9 }
 0x815   : > { %1552 = vmatmul.msk.f32.vlgmr.msra.gmra.mxu2 %vm66_vm0, %v957_v13 }
 0x860   : > { %v1203_v0 = vpop.xlane.xlu0 %1202 }
 0x861   : > { %v1204_v1 = vmul.f32 %v1203_v0, %v1927_v24 }
 0x863   : > { %v1205_v2 = vadd.f32 1e-05, %v1204_v1 }
 0x865   : > { %vm1212_vm14 = vweird.f32 %v1205_v2 }
 0x87e   : > { %v1051_v40 = vpop.f32.mrf.mxu3 }
 0x87f   : > { %v1054_v20 = vsel %vm288_vm13, %v1051_v40, 0.0 }
 0x898   : > { %v984_v18 = vpop.f32.mrf.mxu2 }
 0x899   : > { %v988_v19 = vsel %vm288_vm13, %v984_v18, 0.0 }
 0x89a   : > { %989 = vadd.xlane.f32.xlu2 %v988_v19  ;;  %v1675_v19 = vld [vmem:[%s2363_s11 + $0x1] ss:$0 sm:$0xff] }
 0x8a2   : > { %1055 = vadd.xlane.f32.xlu2 %v1054_v20 }
 0x90d   : > { %v990_v22 = vpop.xlane.xlu2 %989 }
 0x90e   : > { %v998_v23 = vmul.f32 %v990_v22, %v1982_v57 }
 0x910   : > { %v999_v25 = vsub.f32 %v984_v18, %v998_v23 }
 0x912   : > { %v1000_v11 = vmul.f32 %v999_v25, %v999_v25 }
 0x914   : > { %v1001_v26 = vsel %vm288_vm13, %v1000_v11, 0.0 }
 0x915   : > { %1002 = vadd.xlane.f32.xlu1 %v1001_v26  ;;  %v1056_v27 = vpop.xlane.xlu2 %1055  ;;  %v1314_v26 = vld [vmem:[#allocation4 + $0x38] sm:$0xff] }
 0x916   : > { %v1057_v28 = vmul.f32 %v1056_v27, %v1982_v57  ;;  %v1313_v27 = vld [vmem:[#allocation4 + $0x30] sm:$0xff]  ;;  %1334 = vmatpush.msrb.mxu2 %v1314_v26 }
 0x918   : > { %v1058_v29 = vsub.f32 %v1051_v40, %v1057_v28  ;;  %1335 = vmatpush.msrb.mxu2 %v1313_v27  ;;  %v1312_v28 = vld [vmem:[#allocation4 + $0x28] sm:$0xff] }
 0x91a   : > { %v1059_v30 = vmul.f32 %v1058_v29, %v1058_v29  ;;  %1336 = vmatpush.msrb.mxu2 %v1312_v28 }
 0x91c   : > { %v1060_v31 = vsel %vm288_vm13, %v1059_v30, 0.0 }
 0x91d   : > { %1061 = vadd.xlane.f32.xlu2 %v1060_v31  ;;  %v1568_v31 = vld [vmem:[%s2358_s6 + $0x38] sm:$0xff] }
 0x91e   : > { %1272 = vmatpush.msrb.mxu1 %v1568_v31 }
 0x988   : > { %v1003_v32 = vpop.xlane.xlu1 %1002 }
 0x989   : > { %v1004_v33 = vmul.f32 %v1003_v32, %v1982_v57  ;;  %v1567_v32 = vld [vmem:[%s2358_s6 + $0x30] sm:$0xff] }
 0x98a   : > { %1273 = vmatpush.msrb.mxu1 %v1567_v32 }
 0x98b   : > { %v1005_v34 = vadd.f32 1e-05, %v1004_v33 }
 0x98d   : > { %1692 = vrsqrt.f32 %v1005_v34  ;;  %vm1012_vm8 = vweird.f32 %v1005_v34 }
 0x990   : > { %v1062_v12 = vpop.xlane.xlu2 %1061 }
 0x991   : > { %v1063_v35 = vmul.f32 %v1062_v12, %v1982_v57  ;;  %v1566_v12 = vld [vmem:[%s2358_s6 + $0x28] sm:$0xff] }
 0x992   : > { %1274 = vmatpush.msrb.mxu1 %v1566_v12 }
 0x993   : > { %v1693_v36 = vpop.eup %1692  ;;  %v1064_v37 = vadd.f32 1e-05, %v1063_v35 }
 0x994   : > { %v1007_v38 = vmul.f32 %v1693_v36, %v1005_v34  ;;  %vm1013_vm7 = vweird.f32 %v1693_v36 }
 0x995   : > { %1694 = vrsqrt.f32 %v1064_v37  ;;  %vm1014_vm9 = vmor %vm1012_vm8, %vm1013_vm7  ;;  %vm1071_vm11 = vweird.f32 %v1064_v37 }
 0x996   : > { %v1008_v39 = vmul.f32 %v1693_v36, %v1007_v38  ;;  %1696 = vrsqrt.f32 %v1205_v2 }
 0x998   : > { %v1009_v41 = vmul.f32 0.5, %v1008_v39 }
 0x99a   : > { %v1010_v42 = vsub.f32 1.5, %v1009_v41 }
 0x99b   : > { %v1695_v44 = vpop.eup %1694 }
 0x99c   : > { %v1011_v45 = vmul.f32 %v1693_v36, %v1010_v42  ;;  %v1066_v48 = vmul.f32 %v1695_v44, %v1064_v37  ;;  %vm1072_vm10 = vweird.f32 %v1695_v44  ;;  %v1697_v3 = vpop.eup %1696  ;;  %v1565_v37 = vld [vmem:[%s2358_s6 + $0x20] sm:$0xff] }
 0x99d   : > { %vm1073_vm12 = vmor %vm1071_vm11, %vm1072_vm10  ;;  %v1207_v4 = vmul.f32 %v1697_v3, %v1205_v2  ;;  %vm1213_vm15 = vweird.f32 %v1697_v3  ;;  %1275 = vmatpush.msrb.mxu1 %v1565_v37 }
 0x99e   : > { %v1015_v8 = vsel %vm1014_vm9, %v1693_v36, %v1011_v45  ;;  %v1067_v50 = vmul.f32 %v1695_v44, %v1066_v48  ;;  %vm1214_vm2 = vmor %vm1212_vm14, %vm1213_vm15 }
 0x99f   : > { %v1016_v51 = vmul.f32 %v1015_v8, %v999_v25  ;;  %v1208_v5 = vmul.f32 %v1697_v3, %v1207_v4 }
 0x9a0   : > { %v1068_v53 = vmul.f32 0.5, %v1067_v50 }
 0x9a1   : > { %v1020_v43 = vmul.f32 %v1676_v49, %v1016_v51  ;;  %v1209_v6 = vmul.f32 0.5, %v1208_v5 }
 0x9a2   : > { %v1069_v54 = vsub.f32 1.5, %v1068_v53 }
 0x9a3   : > { %v1024_v56 = vadd.f32 %v1677_v52, %v1020_v43  ;;  %v1210_v7 = vsub.f32 1.5, %v1209_v6 }
 0x9a4   : > { %v1070_v58 = vmul.f32 %v1695_v44, %v1069_v54 }
 0x9a5   : > { %1123 = vrot.lane.b32.xlu1 %v1024_v56, %s1780_s23  ;;  %v1554_v9 = vmul.f32 -1.442695, %v1024_v56  ;;  %v1211_v10 = vmul.f32 %v1697_v3, %v1210_v7 }
 0x9a6   : > { %v1074_v60 = vsel %vm1073_vm12, %v1695_v44, %v1070_v58 }
 0x9a7   : > { %v1075_v61 = vmul.f32 %v1074_v60, %v1058_v29  ;;  %1698 = vpow2.f32 %v1554_v9  ;;  %v1215_v13 = vsel %vm1214_vm2, %v1697_v3, %v1211_v10  ;;  %v1311_v29 = vld [vmem:[#allocation4 + $0x20] sm:$0xff] }
 0x9a8   : > { %v1216_v17 = vmul.f32 %v1215_v13, %v2216_v21  ;;  %1337 = vmatpush.msrb.mxu2 %v1311_v29 }
 0x9a9   : > { %v1079_v63 = vmul.f32 %v1678_v59, %v1075_v61 }
 0x9aa   : > { %v1220_v40 = vmul.f32 %v1674_v16, %v1216_v17 }
 0x9ab   : > { %v1083_v46 = vadd.f32 %v1679_v62, %v1079_v63 }
 0x9ac   : > { %v1224_v22 = vadd.f32 %v1675_v19, %v1220_v40 }
 0x9ad   : > { %1129 = vrot.lane.b32.xlu2 %v1083_v46, %s1780_s23  ;;  %1134 = vrot.lane.b32.xlu0 %v1083_v46, %s1781_s28  ;;  %v1555_v14 = vmul.f32 -1.442695, %v1083_v46  ;;  %v1699_v15 = vpop.eup %1698 }
 0x9ae   : > { %v1087_v18 = vadd.f32 1.0, %v1699_v15  ;;  %v1564_v25 = vmul.f32 -1.442695, %v1224_v22 }
 0x9af   : > { %1700 = vpow2.f32 %v1555_v14  ;;  %v1683_v14 = vld [vmem:[%s2360_s8 + $0x1] ss:$0 sm:$0xff] }
 0x9b0   : > { %1702 = vrcp.f32 %v1087_v18  ;;  %v1099_v42 = vand.u32 2147483648, %v1087_v18  ;;  %vm1093_vm4 = vweird.f32 %v1087_v18  ;;  %v1097_v44 = vand.u32 2147483647, %v1087_v18 }
 0x9b2   : > { %v1100_v49 = vor.u32 1.1754944e-38, %v1099_v42  ;;  %vm1098_vm6 = vcmp.eq.f32.partialorder %v1097_v44, 8.507059e+37 }
 0x9b5   : > { %1139 = vrot.lane.b32.xlu2 %v1024_v56, %s1781_s28  ;;  %v1701_v20 = vpop.eup %1700 }
 0x9b6   : > { %v2253_v23 = vadd.f32 1.0, %v1701_v20  ;;  %v1703_v11 = vpop.eup %1702 }
 0x9b7   : > { %v1089_v21 = vmul.f32 %v1703_v11, %v1087_v18  ;;  %vm1094_vm3 = vweird.f32 %v1703_v11 }
 0x9b8   : > { %1704 = vrcp.f32 %v2253_v23  ;;  %vm1095_vm5 = vmor %vm1093_vm4, %vm1094_vm3  ;;  %v1118_v53 = vand.u32 2147483648, %v2253_v23  ;;  %vm1112_vm8 = vweird.f32 %v2253_v23  ;;  %v1116_v54 = vand.u32 2147483647, %v2253_v23 }
 0x9b9   : > { %1706 = vpow2.f32 %v1564_v25  ;;  %v1090_v30 = vsub.f32 1.0, %v1089_v21 }
 0x9ba   : > { %v1119_v62 = vor.u32 1.1754944e-38, %v1118_v53  ;;  %vm1117_vm10 = vcmp.eq.f32.partialorder %v1116_v54, 8.507059e+37 }
 0x9bb   : > { %v1091_v35 = vmul.f32 %v1703_v11, %v1090_v30 }
 0x9bd   : > { %v1092_v39 = vadd.f32 %v1703_v11, %v1091_v35 }
 0x9be   : > { %v1705_v33 = vpop.eup %1704 }
 0x9bf   : > { %v1707_v34 = vpop.eup %1706  ;;  %v1108_v36 = vmul.f32 %v1705_v33, %v2253_v23  ;;  %v1096_v45 = vsel %vm1095_vm5, %v1703_v11, %v1092_v39  ;;  %vm1113_vm7 = vweird.f32 %v1705_v33 }
 0x9c0   : > { %v2272_v38 = vadd.f32 1.0, %v1707_v34  ;;  %v1101_v51 = vsel %vm1098_vm6, %v1100_v49, %v1096_v45  ;;  %vm1114_vm9 = vmor %vm1112_vm8, %vm1113_vm7 }
 0x9c1   : > { %v1109_v41 = vsub.f32 1.0, %v1108_v36  ;;  %v1127_v43 = vsub.f32 1.0, %v1101_v51 }
 0x9c2   : > { %1708 = vrcp.f32 %v2272_v38  ;;  %vm1234_vm11 = vweird.f32 %v2272_v38  ;;  %v1240_v7 = vand.u32 2147483648, %v2272_v38  ;;  %v1238_v13 = vand.u32 2147483647, %v2272_v38 }
 0x9c3   : > { %v1110_v48 = vmul.f32 %v1705_v33, %v1109_v41 }
 0x9c4   : > { %v1241_v40 = vor.u32 1.1754944e-38, %v1240_v7  ;;  %vm1239_vm15 = vcmp.eq.f32.partialorder %v1238_v13, 8.507059e+37 }
 0x9c5   : > { %v1111_v52 = vadd.f32 %v1705_v33, %v1110_v48 }
 0x9c7   : > { %v1115_v60 = vsel %vm1114_vm9, %v1705_v33, %v1111_v52 }
 0x9c8   : > { %v1709_v8 = vpop.eup %1708  ;;  %v1120_v0 = vsel %vm1117_vm10, %v1119_v62, %v1115_v60 }
 0x9c9   : > { %v1230_v56 = vmul.f32 %v1709_v8, %v2272_v38  ;;  %v1138_v2 = vsub.f32 1.0, %v1120_v0  ;;  %vm1235_vm12 = vweird.f32 %v1709_v8 }
 0x9ca   : > { %vm2287_vm14 = vmor %vm1234_vm11, %vm1235_vm12 }
 0x9cb   : > { %v1231_v46 = vsub.f32 1.0, %v1230_v56 }
 0x9cd   : > { %v1232_v3 = vmul.f32 %v1709_v8, %v1231_v46 }
 0x9cf   : > { %v1233_v10 = vadd.f32 %v1709_v8, %v1232_v3 }
 0x9d1   : > { %v1237_v23 = vsel %vm2287_vm14, %v1709_v8, %v1233_v10 }
 0x9d2   : > { %v1242_v27 = vsel %vm1239_vm15, %v1241_v40, %v1237_v23  ;;  %v1440_v23 = vld [vmem:[%s2357_s5 + $0x10] sm:$0xff] }
 0x9d3   : > { %v1245_v29 = vsub.f32 1.0, %v1242_v27  ;;  %v1244_v30 = vmul.f32 %v1242_v27, %v2166_v55 }
 0xa07   : > { %v1130_v50 = vpop.permute.xlu2 %1129 }
 0xa08   : > { %v1132_v59 = vmul.f32 %v1130_v50, %v1127_v43 }
 0xa0f   : > { %v1140_v1 = vpop.permute.xlu2 %1139 }
 0xa10   : > { %v1142_v5 = vmul.f32 %v1140_v1, %v1138_v2  ;;  %v1681_v2 = vld [vmem:[%s2366_s14 + $0x1] ss:$0 sm:$0xff] }
 0xa17   : > { %v1124_v58 = vpop.permute.xlu1 %1123 }
 0xa18   : > { %v1126_v61 = vmul.f32 %v1124_v58, %v1101_v51 }
 0xa1a   : > { %v1133_v63 = vadd.f32 %v1132_v59, %v1126_v61 }
 0xa1c   : > { %1144 = vst.msk [vmem:[#allocation2] sm:$0xff] %vm66_vm0, %v1133_v63 }
 0xa1d   : > { %1147 = vst.msk [vmem:[%s2280_s21] sm:$0xff] %vm66_vm0, %v1133_v63  ;;  %v1680_v63 = vld [vmem:[%s2365_s13 + $0x1] ss:$0 sm:$0xff] }
 0xa1f   : > { %v1135_v4 = vpop.permute.xlu0 %1134 }
 0xa20   : > { %v1137_v6 = vmul.f32 %v1135_v4, %v1120_v0 }
 0xa22   : > { %v1143_v9 = vadd.f32 %v1142_v5, %v1137_v6 }
 0xa24   : > { %1574 = vmatmul.msk.f32.vlgmr.msrb.gmra.mxu2 %vm66_vm0, %v1143_v9  ;;  %v1151_v15 = vld [vmem:[#allocation3 + $0x20] sm:$0xff]  ;;  %v1152_v16 = vld [vmem:[#allocation3 + $0x28] sm:$0xff]  ;;  %v1153_v17 = vld [vmem:[#allocation3 + $0x30] sm:$0xff] }
 0xa25   : > { %v1155_v18 = vsel %vm66_vm0, %v1151_v15, 0.0  ;;  %v1156_v19 = vsel %vm66_vm0, %v1152_v16, 0.0  ;;  %v1154_v20 = vld [vmem:[#allocation3 + $0x38] sm:$0xff]  ;;  %v1158_v25 = vsel %vm66_vm0, %v1153_v17, 0.0  ;;  %v1682_v9 = vld [vmem:[%s2359_s7 + $0x1] ss:$0 sm:$0xff] }
 0xa26   : > { %v1157_v22 = vadd.f32 %v1156_v19, %v1155_v18  ;;  %v1160_v26 = vsel %vm66_vm0, %v1154_v20, 0.0  ;;  %v1441_v18 = vld [vmem:[%s2357_s5 + $0x18] sm:$0xff] }
 0xa27   : > { %1457 = vmatpush.msrb.mxu3 %v1441_v18 }
 0xa28   : > { %v1159_v11 = vadd.f32 %v1158_v25, %v1157_v22  ;;  %v1439_v25 = vld [vmem:[%s2357_s5 + $0x8] sm:$0xff] }
 0xa29   : > { %1458 = vmatpush.msrb.mxu3 %v1440_v23 }
 0xa2a   : > { %v1161_v21 = vadd.f32 %v1160_v26, %v1159_v11  ;;  %v1438_v26 = vld [vmem:[%s2357_s5] sm:$0xff] }
 0xa2b   : > { %1459 = vmatpush.msrb.mxu3 %v1439_v25 }
 0xa2c   : > { %v1162_v28 = vmul.f32 0.25, %v1161_v21 }
 0xa2d   : > { %1460 = vmatpush.msrb.mxu3 %v1438_v26 }
 0xa2e   : > { %v1246_v31 = vmul.f32 %v1245_v29, %v1162_v28 }
 0xa30   : > { %v1247_v32 = vadd.f32 %v1246_v31, %v1244_v30 }
 0xa32   : > { %1571 = vmatmul.msk.f32.vlgmr.msrb.gmra.mxu1 %vm66_vm0, %v1247_v32 }
 0xaa7   : > { %v1339_v33 = vpop.f32.mrf.mxu2 }
 0xaa8   : > { %v1342_v34 = vsel %vm288_vm13, %v1339_v33, 0.0 }
 0xaa9   : > { %1343 = vadd.xlane.f32.xlu0 %v1342_v34 }
 0xaaf   : > { %v1277_v12 = vpop.f32.mrf.mxu1 }
 0xab0   : > { %v1280_v35 = vsel %vm288_vm13, %v1277_v12, 0.0 }
 0xab1   : > { %1281 = vadd.xlane.f32.xlu1 %v1280_v35 }
 0xb1c   : > { %v1344_v36 = vpop.xlane.xlu0 %1343 }
 0xb1d   : > { %v1345_v37 = vmul.f32 %v1344_v36, %v1982_v57 }
 0xb1f   : > { %v1346_v38 = vsub.f32 %v1339_v33, %v1345_v37 }
 0xb21   : > { %v1347_v39 = vmul.f32 %v1346_v38, %v1346_v38 }
 0xb23   : > { %v1348_v41 = vsel %vm288_vm13, %v1347_v39, 0.0 }
 0xb24   : > { %v1282_v55 = vpop.xlane.xlu1 %1281  ;;  %1349 = vadd.xlane.f32.xlu1 %v1348_v41 }
 0xb25   : > { %v1283_v42 = vmul.f32 %v1282_v55, %v1982_v57 }
 0xb27   : > { %v1284_v44 = vsub.f32 %v1277_v12, %v1283_v42 }
 0xb29   : > { %v1285_v45 = vmul.f32 %v1284_v44, %v1284_v44 }
 0xb2b   : > { %v1286_v48 = vsel %vm288_vm13, %v1285_v45, 0.0 }
 0xb2c   : > { %1287 = vadd.xlane.f32.xlu2 %v1286_v48 }
 0xb97   : > { %v1350_v49 = vpop.xlane.xlu1 %1349 }
 0xb98   : > { %v1351_v8 = vmul.f32 %v1350_v49, %v1982_v57 }
 0xb9a   : > { %v1352_v50 = vadd.f32 1e-05, %v1351_v8 }
 0xb9c   : > { %1710 = vrsqrt.f32 %v1352_v50  ;;  %vm1359_vm3 = vweird.f32 %v1352_v50 }
 0xb9f   : > { %v1288_v51 = vpop.xlane.xlu2 %1287 }
 0xba0   : > { %v1289_v52 = vmul.f32 %v1288_v51, %v1982_v57 }
 0xba2   : > { %v1711_v53 = vpop.eup %1710  ;;  %v1290_v43 = vadd.f32 1e-05, %v1289_v52 }
 0xba3   : > { %v1354_v54 = vmul.f32 %v1711_v53, %v1352_v50  ;;  %vm1360_vm2 = vweird.f32 %v1711_v53 }
 0xba4   : > { %1712 = vrsqrt.f32 %v1290_v43  ;;  %vm1361_vm4 = vmor %vm1359_vm3, %vm1360_vm2  ;;  %vm1297_vm6 = vweird.f32 %v1290_v43 }
 0xba5   : > { %v1355_v56 = vmul.f32 %v1711_v53, %v1354_v54 }
 0xba7   : > { %v1356_v58 = vmul.f32 0.5, %v1355_v56 }
 0xba9   : > { %v1357_v59 = vsub.f32 1.5, %v1356_v58 }
 0xbaa   : > { %v1713_v60 = vpop.eup %1712 }
 0xbab   : > { %v1358_v61 = vmul.f32 %v1711_v53, %v1357_v59  ;;  %v1292_v62 = vmul.f32 %v1713_v60, %v1290_v43  ;;  %vm1298_vm5 = vweird.f32 %v1713_v60 }
 0xbac   : > { %vm1299_vm7 = vmor %vm1297_vm6, %vm1298_vm5 }
 0xbad   : > { %v1362_v46 = vsel %vm1361_vm4, %v1711_v53, %v1358_v61  ;;  %v1293_v0 = vmul.f32 %v1713_v60, %v1292_v62 }
 0xbae   : > { %v1363_v1 = vmul.f32 %v1362_v46, %v1346_v38 }
 0xbaf   : > { %v1294_v3 = vmul.f32 0.5, %v1293_v0 }
 0xbb0   : > { %v1367_v4 = vmul.f32 %v1680_v63, %v1363_v1 }
 0xbb1   : > { %v1295_v5 = vsub.f32 1.5, %v1294_v3 }
 0xbb2   : > { %v1371_v6 = vadd.f32 %v1681_v2, %v1367_v4 }
 0xbb3   : > { %v1296_v7 = vmul.f32 %v1713_v60, %v1295_v5 }
 0xbb4   : > { %1422 = vrot.lane.b32.xlu0 %v1371_v6, %s1781_s28  ;;  %v1576_v17 = vmul.f32 -1.442695, %v1371_v6 }
 0xbb5   : > { %v1300_v10 = vsel %vm1299_vm7, %v1713_v60, %v1296_v7 }
 0xbb6   : > { %v1301_v13 = vmul.f32 %v1300_v10, %v1284_v44  ;;  %1714 = vpow2.f32 %v1576_v17 }
 0xbb8   : > { %v1305_v15 = vmul.f32 %v1682_v9, %v1301_v13 }
 0xbba   : > { %v1309_v16 = vadd.f32 %v1683_v14, %v1305_v15 }
 0xbbc   : > { %1427 = vrot.lane.b32.xlu2 %v1309_v16, %s1781_s28  ;;  %1411 = vrot.lane.b32.xlu1 %v1309_v16, %s1780_s23  ;;  %v1575_v19 = vmul.f32 -1.442695, %v1309_v16  ;;  %v1715_v40 = vpop.eup %1714 }
 0xbbd   : > { %1417 = vrot.lane.b32.xlu0 %v1371_v6, %s1780_s23  ;;  %v1394_v20 = vadd.f32 1.0, %v1715_v40 }
 0xbbe   : > { %1716 = vpow2.f32 %v1575_v19 }
 0xbbf   : > { %1718 = vrcp.f32 %v1394_v20  ;;  %v1406_v33 = vand.u32 2147483648, %v1394_v20  ;;  %vm1400_vm9 = vweird.f32 %v1394_v20  ;;  %v1404_v12 = vand.u32 2147483647, %v1394_v20 }
 0xbc1   : > { %v1407_v36 = vor.u32 1.1754944e-38, %v1406_v33  ;;  %vm1405_vm11 = vcmp.eq.f32.partialorder %v1404_v12, 8.507059e+37 }
 0xbc4   : > { %v1717_v22 = vpop.eup %1716 }
 0xbc5   : > { %v1375_v11 = vadd.f32 1.0, %v1717_v22  ;;  %v1719_v27 = vpop.eup %1718 }
 0xbc6   : > { %v1396_v21 = vmul.f32 %v1719_v27, %v1394_v20  ;;  %vm1401_vm8 = vweird.f32 %v1719_v27 }
 0xbc7   : > { %1720 = vrcp.f32 %v1375_v11  ;;  %vm1402_vm10 = vmor %vm1400_vm9, %vm1401_vm8  ;;  %v1387_v42 = vand.u32 2147483648, %v1375_v11  ;;  %vm1381_vm14 = vweird.f32 %v1375_v11  ;;  %v1385_v45 = vand.u32 2147483647, %v1375_v11 }
 0xbc8   : > { %v1397_v28 = vsub.f32 1.0, %v1396_v21 }
 0xbc9   : > { %v1388_v51 = vor.u32 1.1754944e-38, %v1387_v42  ;;  %vm1386_vm2 = vcmp.eq.f32.partialorder %v1385_v45, 8.507059e+37 }
 0xbca   : > { %v1398_v30 = vmul.f32 %v1719_v27, %v1397_v28 }
 0xbcc   : > { %v1399_v32 = vadd.f32 %v1719_v27, %v1398_v30 }
 0xbcd   : > { %v1721_v29 = vpop.eup %1720 }
 0xbce   : > { %v1377_v31 = vmul.f32 %v1721_v29, %v1375_v11  ;;  %v1403_v35 = vsel %vm1402_vm10, %v1719_v27, %v1399_v32  ;;  %vm1382_vm12 = vweird.f32 %v1721_v29 }
 0xbcf   : > { %v1408_v38 = vsel %vm1405_vm11, %v1407_v36, %v1403_v35  ;;  %vm1383_vm15 = vmor %vm1381_vm14, %vm1382_vm12 }
 0xbd0   : > { %v1378_v34 = vsub.f32 1.0, %v1377_v31  ;;  %v1426_v55 = vsub.f32 1.0, %v1408_v38 }
 0xbd2   : > { %v1379_v37 = vmul.f32 %v1721_v29, %v1378_v34 }
 0xbd4   : > { %v1380_v41 = vadd.f32 %v1721_v29, %v1379_v37 }
 0xbd6   : > { %v1384_v8 = vsel %vm1383_vm15, %v1721_v29, %v1380_v41 }
 0xbd7   : > { %v1389_v53 = vsel %vm1386_vm2, %v1388_v51, %v1384_v8 }
 0xbd8   : > { %v1415_v54 = vsub.f32 1.0, %v1389_v53 }
 0xc16   : > { %v1428_v39 = vpop.permute.xlu2 %1427 }
 0xc17   : > { %v1430_v48 = vmul.f32 %v1428_v39, %v1426_v55 }
 0xc26   : > { %v1423_v44 = vpop.permute.xlu0 %1422 }
 0xc27   : > { %v1425_v49 = vmul.f32 %v1423_v44, %v1408_v38 }
 0xc29   : > { %v1431_v50 = vadd.f32 %v1430_v48, %v1425_v49 }
 0xc2b   : > { %v1437_v52 = vadd.f32 %v1431_v50, %v2204_v47 }
 0xc2d   : > { %1579 = vmatmul.msk.f32.vlgmr.msrb.gmra.mxu3 %vm66_vm0, %v1437_v52 }
 0xc2e   : > { %v1412_v43 = vpop.permute.xlu1 %1411 }
 0xc2f   : > { %v1414_v56 = vmul.f32 %v1412_v43, %v1389_v53  ;;  %v1418_v58 = vpop.permute.xlu0 %1417 }
 0xc30   : > { %v1420_v59 = vmul.f32 %v1418_v58, %v1415_v54 }
 0xc32   : > { %v1421_v60 = vadd.f32 %v1420_v59, %v1414_v56 }
 0xc34   : > { %1432 = vst.msk [vmem:[#allocation2 + $0x8] sm:$0xff] %vm66_vm0, %v1421_v60 }
 0xc35   : > { %1578 = vst.msk [vmem:[%s2280_s21 + $0x20] sm:$0xff] %vm66_vm0, %v1421_v60 }
 0xcad   :  { %772 = sbr.rel (!%p770_p5) target bundleno = 1633 (0x661), region = 140 }
 0xcb0   : > { %v1462_v34 = vpop.f32.mrf.mxu3  }
 0xcb1   : > { %1466 = vst.msk [vmem:[%s1465_s29] sm:$0xff] %vm91_vm1, %v1462_v34 }
 0xcb2   :  { %1471 = vsyncpa [#allocation5], 1 }

</bundles_post_ra>
